<compile_context>
chip_gen: v7x
topology: tpu7x:2x2x1
jax: 0.10.0
libtpu: 0.0.40
codegen_flags: <defaults>
</compile_context>

<pallas_src>
import functools

import jax
import jax.numpy as jnp
from jax import lax
from jax.experimental import pallas as pl
from jax.experimental.pallas import tpu as pltpu  # noqa: F401  (TPU backend)

# ------------------------- small, module-consistent sizes -------------------
D = 128        # d_model   (scaled down from 768)
K = 256        # d_llm     (scaled down from 4096)
FF = 4 * D     # expert hidden dim
E = 8          # num_experts
TOPK = 2
M = 4          # mask tokens per sentence (matches the 4-slot impute padding)
B = 2          # batch
WK = 2         # number of week sentences
MO = 2         # number of month sentences
S = 5          # stats length
LANES = 128    # TPU lane width (pad minor dims to this)
GATE_PAD = LANES  # gate output padded to a full lane tile


# =========================== fused model kernel =============================
def _fused_kernel(mask_ref, txt_ref, week_ref, month_ref, vis_ref, stats_ref,
                  wcat1_ref, bcat1_ref, w2bd_ref, b2cat_ref, w3_ref, b3_ref,
                  inw_ref, inb_ref, o1w_ref, o1b_ref, o2w_ref, o2b_ref,
                  out_ref, *, batch, n_mask, seq_len, n_experts, d_model):
    neg = jnp.float32(-1e30)

    # ---------------- MoE_ffn over mask-token embeddings (Model.impute) ------
    h = mask_ref[...]                                   # (N, D) f32, N = B*M
    h_bf = h.astype(jnp.bfloat16)

    # gate + expert0.fc1 + expert1.fc1 fused into ONE bf16 MXU matmul
    # (wcat1 = [gate_pad(128) | w1_0(4D) | w1_1(4D)], f32 accumulation).
    hw = jnp.dot(h_bf, wcat1_ref[...], preferred_element_type=jnp.float32)
    hw = hw + bcat1_ref[...]                            # gate "bias" lanes are 0
    logits = hw[:, :GATE_PAD]                           # (N, 128) gate logits
    z = jnp.maximum(hw[:, GATE_PAD:], 0.0)              # (N, 8D) [z0|z1]; dropout=id

    # softmax in f32 (matches F.softmax(..., dtype=torch.float)); padded lanes
    # masked to -inf.  lane iota reused below for the fc3 bias injection.
    lane = lax.broadcasted_iota(jnp.int32, logits.shape, 1)
    logits = jnp.where(lane < n_experts, logits, neg)
    mrow = jnp.max(logits, axis=1, keepdims=True)
    eexp = jnp.exp(logits - mrow)                       # padded lanes -> 0
    inv_sum = pl.reciprocal(jnp.sum(eexp, axis=1, keepdims=True), approx=True)
    probs = eexp * inv_sum                              # (N, 128)

    # top-2 routing *values* (lowest-index tie-break like torch.topk).
    # NOTE: the reference module indexes `self.experts[j]` with the top-k
    # position j (0, 1), not the selected expert id, so only experts 0 and 1
    # are ever evaluated; we keep that semantics.
    max1 = jnp.max(probs, axis=1, keepdims=True)
    first_col = jnp.min(jnp.where(probs == max1, lane, n_experts),
                        axis=1, keepdims=True)
    max2 = jnp.max(jnp.where(lane == first_col, neg, probs),
                   axis=1, keepdims=True)
    inv_den = pl.reciprocal(max1 + max2, approx=True)   # renorm top-k
    w_a = max1 * inv_den                                # (N, 1)
    w_b = max2 * inv_den

    # expert0.fc2 + expert1.fc2 fused into ONE block-diagonal MXU matmul
    o = jnp.dot(z.astype(jnp.bfloat16), w2bd_ref[...],
                preferred_element_type=jnp.float32) + b2cat_ref[...]  # (N, 2D)
    o0 = h + o[:, :d_model]                             # residual, expert 0
    o1 = h + o[:, d_model:]                             # residual, expert 1

    # fc3 as a VPU lane reduction, fused with the top-2 mixing.  The reduce is
    # done on the (B, M, D) view so the result lands directly in (B, M) *lane*
    # layout for the packed output (no sublane->lane transpose).
    bias_rows = w_a * b3_ref[0] + w_b * b3_ref[1]       # (N, 1)
    ew = w_a * (o0 * w3_ref[0]) + w_b * (o1 * w3_ref[1])  # (N, D)
    ew = ew + jnp.where(lane == 0, bias_rows, 0.0)      # inject fc3 bias at lane 0
    imp_bm = jnp.sum(ew.reshape(batch, n_mask, d_model), axis=-1)   # (B, M)

    # ---------------- LLM_Decoder numeric path (pool-then-project) -----------
    # TODO(synk): prompt construction / tokenizer / LLaMA forward have no
    # Pallas equivalent; mean-pooling before in_layer is only valid because
    # the retained path between in_layer and the pool is linear (no LLaMA).
    pooled = (txt_ref[...] + vis_ref[...]
              + jnp.sum(week_ref[...], axis=1)
              + jnp.sum(month_ref[...], axis=1)) * jnp.float32(1.0 / seq_len)
    t = jnp.dot(pooled.astype(jnp.bfloat16), inw_ref[...],
                preferred_element_type=jnp.float32) + inb_ref[...]   # (B, K)
    h1 = jnp.dot(t.astype(jnp.bfloat16), o1w_ref[...],
                 preferred_element_type=jnp.float32) + o1b_ref[...]  # (B, D)
    dec = jnp.sum(h1 * o2w_ref[...], axis=-1, keepdims=True) + o2b_ref[...]  # (B, 1)

    # ---------------- per-batch stats (min / max / trend) --------------------
    # stats_ref is padded to 128 lanes with -11.0 ("missing") -> full-width ops.
    s = stats_ref[...]                                  # (B, 128)
    col = lax.broadcasted_iota(jnp.int32, s.shape, 1)   # reused for packing
    valid = s != -11.0
    cnt = jnp.sum(valid.astype(jnp.float32), axis=1, keepdims=True)
    big = jnp.float32(1e30)
    mn = jnp.min(jnp.where(valid, s, big), axis=1, keepdims=True)
    mx = jnp.max(jnp.where(valid, s, -big), axis=1, keepdims=True)
    first_c = jnp.min(jnp.where(valid, col, s.shape[1]), axis=1, keepdims=True)
    last_c = jnp.max(jnp.where(valid, col, -1), axis=1, keepdims=True)
    first_v = jnp.sum(jnp.where(col == first_c, s, 0.0), axis=1, keepdims=True)
    last_v = jnp.sum(jnp.where(col == last_c, s, 0.0), axis=1, keepdims=True)
    mn = jnp.where(cnt > 0, mn, jnp.nan)
    mx = jnp.where(cnt > 0, mx, jnp.nan)
    # valid_stats.diff().sum() == last_valid - first_valid (0 if <2 valid)
    tr = jnp.where(cnt > 1, last_v - first_v, 0.0)

    # ---------------- single lane-packed (B, 128) output ---------------------
    # lanes 0..M-1: impute values, lane M: decoder out, M+1..M+3: min/max/trend
    packed = jnp.where(col == n_mask, dec, 0.0)
    packed = packed + jnp.where(col == n_mask + 1, mn, 0.0)
    packed = packed + jnp.where(col == n_mask + 2, mx, 0.0)
    packed = packed + jnp.where(col == n_mask + 3, tr, 0.0)
    for mm in range(n_mask):
        packed = packed + jnp.where(col == mm, imp_bm[:, mm:mm + 1], 0.0)
    out_ref[...] = packed                               # one unmasked vst slab


# ============================== Model glue ==================================
@jax.jit
def model_forward(kp, mask_embeds, imputed_text_embed, week_embeds,
                  month_embeds, vision_embed, stats):
    bq, m, d = mask_embeds.shape
    seq_len = 1 + week_embeds.shape[1] + month_embeds.shape[1] + 1

    # TODO(synk): DistilBERT re-encode of generated sentences / week / month
    # sentences and the Swin vision encoder have no Pallas equivalent; their
    # CLS embeddings are provided as direct inputs.
    mask_flat = mask_embeds.reshape(bq * m, d)          # contiguous -> free

    # TODO(synk): prompt string construction + tokenizer are untranslatable;
    # only the numeric stats features (min/max/trend) are computed here.
    n_stats = stats.shape[1]
    stats_pad = jnp.full((bq, LANES), -11.0, jnp.float32).at[:, :n_stats].set(stats)

    kernel = functools.partial(_fused_kernel, batch=bq, n_mask=m,
                               seq_len=seq_len, n_experts=E, d_model=d)

    # TODO(synk): at real sizes (d_model=768, d_llm=4096) the weights must be
    # grid/K-tiled with BlockSpecs (leading "parallel" axis for v7x's 2 TCs)
    # and pltpu.CompilerParams(vmem_limit_bytes=...) sized per generation from
    # pltpu.get_tpu_info().vmem_capacity_bytes (v5e 16 MiB scoped default,
    # v6e/v7x 32 MiB scoped, v7x 64 MiB physical); ungridded they do not fit.
    out = pl.pallas_call(
        kernel,
        out_shape=jax.ShapeDtypeStruct((bq, LANES), jnp.float32),
    )(mask_flat, imputed_text_embed, week_embeds, month_embeds, vision_embed,
      stats_pad,
      kp["w_cat1"], kp["b_cat1"], kp["w2_bd"], kp["b2_cat"], kp["w3"], kp["b3"],
      kp["in_w"], kp["in_b"], kp["o1_w"], kp["o1_b"], kp["o2_w"], kp["o2_b"])

    impute_val = out[:, :m]                 # (B, M)
    outputs = out[:, m:m + 1]               # (B, 1)
    mn = out[:, m + 1:m + 2]
    mx = out[:, m + 2:m + 3]
    trend = out[:, m + 3:m + 4]
    return outputs, impute_val, (mn, mx, trend)


def median_valid(stats):
    # median over valid entries (glue; only feeds the untranslatable prompt path)
    valid = stats != -11.0
    cnt = valid.sum(axis=1)
    sorted_vals = jnp.sort(jnp.where(valid, stats, jnp.inf), axis=1)
    idx = jnp.maximum((cnt - 1) // 2, 0)
    med = jnp.take_along_axis(sorted_vals, idx[:, None], axis=1)[:, 0]
    return jnp.where(cnt > 0, med, jnp.nan)


def init_params(key):
    ks = jax.random.split(key, 12)

    def w(k, shape, scale=0.02):
        return jax.random.normal(k, shape, jnp.float32) * scale

    moe = dict(
        gate_w=w(ks[0], (D, E)),
        w1=w(ks[1], (2, D, FF)),
        b1=w(ks[2], (2, 1, FF)),
        w2=w(ks[3], (2, FF, D)),
        b2=w(ks[4], (2, 1, D)),
        w3=w(ks[5], (2, 1, D)),      # fc3 weight stored as a row (VPU reduce)
        b3=w(ks[6], (2, 1, 1)),
    )
    dec = dict(
        in_w=w(ks[7], (D, K)),
        in_b=w(ks[8], (1, K)),
        o1_w=w(ks[9], (K, D)),
        o1_b=w(ks[10], (1, D)),
        o2_w=w(ks[11], (1, D)),      # out_layer[-1] weight stored as a row
        o2_b=jnp.zeros((1, 1), jnp.float32),
    )
    return dict(moe=moe, decoder=dec)


def pack_params(params):
    """One-time (outside the jitted forward) packing: bf16 casts, gate lane-pad,
    fc1 concat, fc2 block-diagonal.  Removes all per-call convert/pad ops."""
    moe, dec = params["moe"], params["decoder"]
    gate_pad = jnp.zeros((D, GATE_PAD), jnp.float32).at[:, :E].set(moe["gate_w"])
    w_cat1 = jnp.concatenate([gate_pad, moe["w1"][0], moe["w1"][1]],
                             axis=1).astype(jnp.bfloat16)            # (D, 128+8D)
    b_cat1 = jnp.concatenate([jnp.zeros((1, GATE_PAD), jnp.float32),
                              moe["b1"][0], moe["b1"][1]], axis=1)   # (1, 128+8D)
    w2_bd = jnp.zeros((2 * FF, 2 * D), jnp.float32)
    w2_bd = w2_bd.at[:FF, :D].set(moe["w2"][0]).at[FF:, D:].set(moe["w2"][1])
    w2_bd = w2_bd.astype(jnp.bfloat16)                               # (8D, 2D)
    b2_cat = jnp.concatenate([moe["b2"][0], moe["b2"][1]], axis=1)   # (1, 2D)
    return dict(
        w_cat1=w_cat1, b_cat1=b_cat1, w2_bd=w2_bd, b2_cat=b2_cat,
        w3=moe["w3"], b3=moe["b3"],
        in_w=dec["in_w"].astype(jnp.bfloat16), in_b=dec["in_b"],
        o1_w=dec["o1_w"].astype(jnp.bfloat16), o1_b=dec["o1_b"],
        o2_w=dec["o2_w"], o2_b=dec["o2_b"])


if __name__ == "__main__":
    key = jax.random.PRNGKey(0)
    kp_key, k1, k2, k3, k4, k5, k6 = jax.random.split(key, 7)
    params = pack_params(init_params(kp_key))

    mask_embeds = jax.random.normal(k1, (B, M, D), jnp.float32)
    imputed_text = jax.random.normal(k2, (B, D), jnp.float32)
    week_embeds = jax.random.normal(k3, (B, WK, D), jnp.float32)
    month_embeds = jax.random.normal(k4, (B, MO, D), jnp.float32)
    vision_embed = jax.random.normal(k5, (B, D), jnp.float32)
    stats = jax.random.normal(k6, (B, S), jnp.float32)
    stats = stats.at[0, 3].set(-11.0)   # one "missing" entry

    outputs, impute_val, (mn, mx, trend) = model_forward(
        params, mask_embeds, imputed_text, week_embeds, month_embeds,
        vision_embed, stats)
    med = median_valid(stats)

    jax.block_until_ready((outputs, impute_val, mn, mx, trend, med))
    assert outputs.shape == (B, 1)
    assert impute_val.shape == (B, M)
    assert mn.shape == (B, 1) and mx.shape == (B, 1) and trend.shape == (B, 1)
    assert bool(jnp.all(jnp.isfinite(outputs))) and bool(jnp.all(jnp.isfinite(impute_val)))
    assert bool(jnp.all(jnp.isfinite(mn))) and bool(jnp.all(jnp.isfinite(mx)))
    print("KERNEL_OK")
</pallas_src>

<mosaic_0001>
module attributes {stable_mosaic.version = 11 : i64} {
  func.func @_fused_kernel(%arg0: memref<8x128xf32, #tpu.memory_space<vmem>>, %arg1: memref<2x128xf32, #tpu.memory_space<vmem>>, %arg2: memref<2x2x128xf32, #tpu.memory_space<vmem>>, %arg3: memref<2x2x128xf32, #tpu.memory_space<vmem>>, %arg4: memref<2x128xf32, #tpu.memory_space<vmem>>, %arg5: memref<2x128xf32, #tpu.memory_space<vmem>>, %arg6: memref<128x1152xbf16, #tpu.memory_space<vmem>>, %arg7: memref<1x1152xf32, #tpu.memory_space<vmem>>, %arg8: memref<1024x256xbf16, #tpu.memory_space<vmem>>, %arg9: memref<1x256xf32, #tpu.memory_space<vmem>>, %arg10: memref<2x1x128xf32, #tpu.memory_space<vmem>>, %arg11: memref<2x1x1xf32, #tpu.memory_space<vmem>>, %arg12: memref<128x256xbf16, #tpu.memory_space<vmem>>, %arg13: memref<1x256xf32, #tpu.memory_space<vmem>>, %arg14: memref<256x128xbf16, #tpu.memory_space<vmem>>, %arg15: memref<1x128xf32, #tpu.memory_space<vmem>>, %arg16: memref<1x128xf32, #tpu.memory_space<vmem>>, %arg17: memref<1x1xf32, #tpu.memory_space<vmem>>, %arg18: memref<2x128xf32, #tpu.memory_space<vmem>>) attributes {dimension_semantics = [], scalar_prefetch = 0 : i64, scratch_operands = 0 : i64, tpu.core_type = #tpu.core_type<tc>} {
    %c0 = arith.constant 0 : index
    %c0_0 = arith.constant 0 : index
    %0 = vector.load %arg0[%c0, %c0_0] : memref<8x128xf32, #tpu.memory_space<vmem>>, vector<8x128xf32>
    %1 = arith.truncf %0 : vector<8x128xf32> to vector<8x128xbf16>
    %c0_1 = arith.constant 0 : index
    %c0_2 = arith.constant 0 : index
    %2 = vector.load %arg6[%c0_1, %c0_2] : memref<128x1152xbf16, #tpu.memory_space<vmem>>, vector<128x1152xbf16>
    %cst = arith.constant dense<0.000000e+00> : vector<8x1152xf32>
    %3 = tpu.matmul %1, %2, %cst {dimension_numbers = #tpu.dot_dimension_numbers<[1], [0], [0], [1], [0, 0, 1, 1], [], []>} : vector<8x128xbf16>, vector<128x1152xbf16>, vector<8x1152xf32> -> vector<8x1152xf32>
    %c0_3 = arith.constant 0 : index
    %c0_4 = arith.constant 0 : index
    %4 = vector.load %arg7[%c0_3, %c0_4] : memref<1x1152xf32, #tpu.memory_space<vmem>>, vector<1x1152xf32>
    %5 = vector.broadcast %4 : vector<1x1152xf32> to vector<8x1152xf32>
    %6 = arith.addf %3, %5 : vector<8x1152xf32>
    %7 = vector.extract_strided_slice %6 {offsets = [0, 0], sizes = [8, 128], strides = [1, 1]} : vector<8x1152xf32> to vector<8x128xf32>
    %8 = vector.extract_strided_slice %6 {offsets = [0, 128], sizes = [8, 1024], strides = [1, 1]} : vector<8x1152xf32> to vector<8x1024xf32>
    %cst_5 = arith.constant 0.000000e+00 : f32
    %9 = vector.broadcast %cst_5 : f32 to vector<8x1024xf32>
    %10 = arith.maximumf %8, %9 : vector<8x1024xf32>
    %11 = tpu.iota {dimensions = array<i32: 1>} : vector<8x128xi32>
    %c8_i32 = arith.constant 8 : i32
    %12 = vector.broadcast %c8_i32 : i32 to vector<8x128xi32>
    %13 = arith.cmpi slt, %11, %12 : vector<8x128xi32>
    %cst_6 = arith.constant -1.000000e+30 : f32
    %14 = vector.broadcast %cst_6 : f32 to vector<8x128xf32>
    %15 = arith.select %13, %7, %14 : vector<8x128xi1>, vector<8x128xf32>
    %cst_7 = arith.constant dense<0xFF800000> : vector<8xf32>
    %16 = vector.multi_reduction <maximumf>, %15, %cst_7 [1] : vector<8x128xf32> to vector<8xf32>
    %17 = vector.shape_cast %16 : vector<8xf32> to vector<8x1xf32>
    %18 = vector.broadcast %17 : vector<8x1xf32> to vector<8x128xf32>
    %19 = arith.subf %15, %18 : vector<8x128xf32>
    %20 = math.exp %19 : vector<8x128xf32>
    %cst_8 = arith.constant dense<0.000000e+00> : vector<8xf32>
    %21 = vector.multi_reduction <add>, %20, %cst_8 [1] : vector<8x128xf32> to vector<8xf32>
    %22 = vector.shape_cast %21 : vector<8xf32> to vector<8x1xf32>
    %23 = tpu.reciprocal %22 {approx = true} : vector<8x1xf32> -> vector<8x1xf32>
    %24 = vector.broadcast %23 : vector<8x1xf32> to vector<8x128xf32>
    %25 = arith.mulf %20, %24 : vector<8x128xf32>
    %cst_9 = arith.constant dense<0xFF800000> : vector<8xf32>
    %26 = vector.multi_reduction <maximumf>, %25, %cst_9 [1] : vector<8x128xf32> to vector<8xf32>
    %27 = vector.shape_cast %26 : vector<8xf32> to vector<8x1xf32>
    %28 = vector.broadcast %27 : vector<8x1xf32> to vector<8x128xf32>
    %29 = arith.cmpf oeq, %25, %28 : vector<8x128xf32>
    %c8_i32_10 = arith.constant 8 : i32
    %30 = vector.broadcast %c8_i32_10 : i32 to vector<8x128xi32>
    %31 = arith.select %29, %11, %30 : vector<8x128xi1>, vector<8x128xi32>
    %cst_11 = arith.constant dense<2147483647> : vector<8xi32>
    %32 = vector.multi_reduction <minsi>, %31, %cst_11 [1] : vector<8x128xi32> to vector<8xi32>
    %33 = vector.shape_cast %32 : vector<8xi32> to vector<8x1xi32>
    %34 = vector.broadcast %33 : vector<8x1xi32> to vector<8x128xi32>
    %35 = arith.cmpi eq, %11, %34 : vector<8x128xi32>
    %cst_12 = arith.constant -1.000000e+30 : f32
    %36 = vector.broadcast %cst_12 : f32 to vector<8x128xf32>
    %37 = arith.select %35, %36, %25 : vector<8x128xi1>, vector<8x128xf32>
    %cst_13 = arith.constant dense<0xFF800000> : vector<8xf32>
    %38 = vector.multi_reduction <maximumf>, %37, %cst_13 [1] : vector<8x128xf32> to vector<8xf32>
    %39 = vector.shape_cast %38 : vector<8xf32> to vector<8x1xf32>
    %40 = arith.addf %27, %39 : vector<8x1xf32>
    %41 = tpu.reciprocal %40 {approx = true} : vector<8x1xf32> -> vector<8x1xf32>
    %42 = arith.mulf %27, %41 : vector<8x1xf32>
    %43 = arith.mulf %39, %41 : vector<8x1xf32>
    %44 = arith.truncf %10 : vector<8x1024xf32> to vector<8x1024xbf16>
    %c0_14 = arith.constant 0 : index
    %c0_15 = arith.constant 0 : index
    %45 = vector.load %arg8[%c0_14, %c0_15] : memref<1024x256xbf16, #tpu.memory_space<vmem>>, vector<1024x256xbf16>
    %cst_16 = arith.constant dense<0.000000e+00> : vector<8x256xf32>
    %46 = tpu.matmul %44, %45, %cst_16 {dimension_numbers = #tpu.dot_dimension_numbers<[1], [0], [0], [1], [0, 0, 1, 1], [], []>} : vector<8x1024xbf16>, vector<1024x256xbf16>, vector<8x256xf32> -> vector<8x256xf32>
    %c0_17 = arith.constant 0 : index
    %c0_18 = arith.constant 0 : index
    %47 = vector.load %arg9[%c0_17, %c0_18] : memref<1x256xf32, #tpu.memory_space<vmem>>, vector<1x256xf32>
    %48 = vector.broadcast %47 : vector<1x256xf32> to vector<8x256xf32>
    %49 = arith.addf %46, %48 : vector<8x256xf32>
    %50 = vector.extract_strided_slice %49 {offsets = [0, 0], sizes = [8, 128], strides = [1, 1]} : vector<8x256xf32> to vector<8x128xf32>
    %51 = arith.addf %0, %50 : vector<8x128xf32>
    %52 = vector.extract_strided_slice %49 {offsets = [0, 128], sizes = [8, 128], strides = [1, 1]} : vector<8x256xf32> to vector<8x128xf32>
    %53 = arith.addf %0, %52 : vector<8x128xf32>
    %c0_19 = arith.constant 0 : index
    %c0_20 = arith.constant 0 : index
    %c0_21 = arith.constant 0 : index
    %54 = vector.load %arg11[%c0_19, %c0_20, %c0_21] : memref<2x1x1xf32, #tpu.memory_space<vmem>>, vector<1x1x1xf32>
    %55 = vector.shape_cast %54 : vector<1x1x1xf32> to vector<1x1xf32>
    %56 = vector.broadcast %55 : vector<1x1xf32> to vector<8x1xf32>
    %57 = arith.mulf %42, %56 : vector<8x1xf32>
    %c1 = arith.constant 1 : index
    %c0_22 = arith.constant 0 : index
    %c0_23 = arith.constant 0 : index
    %58 = vector.load %arg11[%c1, %c0_22, %c0_23] : memref<2x1x1xf32, #tpu.memory_space<vmem>>, vector<1x1x1xf32>
    %59 = vector.shape_cast %58 : vector<1x1x1xf32> to vector<1x1xf32>
    %60 = vector.broadcast %59 : vector<1x1xf32> to vector<8x1xf32>
    %61 = arith.mulf %43, %60 : vector<8x1xf32>
    %62 = arith.addf %57, %61 : vector<8x1xf32>
    %c0_24 = arith.constant 0 : index
    %c0_25 = arith.constant 0 : index
    %c0_26 = arith.constant 0 : index
    %63 = vector.load %arg10[%c0_24, %c0_25, %c0_26] : memref<2x1x128xf32, #tpu.memory_space<vmem>>, vector<1x1x128xf32>
    %64 = vector.shape_cast %63 : vector<1x1x128xf32> to vector<1x128xf32>
    %65 = vector.broadcast %64 : vector<1x128xf32> to vector<8x128xf32>
    %66 = arith.mulf %51, %65 : vector<8x128xf32>
    %67 = vector.broadcast %42 : vector<8x1xf32> to vector<8x128xf32>
    %68 = arith.mulf %67, %66 : vector<8x128xf32>
    %c1_27 = arith.constant 1 : index
    %c0_28 = arith.constant 0 : index
    %c0_29 = arith.constant 0 : index
    %69 = vector.load %arg10[%c1_27, %c0_28, %c0_29] : memref<2x1x128xf32, #tpu.memory_space<vmem>>, vector<1x1x128xf32>
    %70 = vector.shape_cast %69 : vector<1x1x128xf32> to vector<1x128xf32>
    %71 = vector.broadcast %70 : vector<1x128xf32> to vector<8x128xf32>
    %72 = arith.mulf %53, %71 : vector<8x128xf32>
    %73 = vector.broadcast %43 : vector<8x1xf32> to vector<8x128xf32>
    %74 = arith.mulf %73, %72 : vector<8x128xf32>
    %75 = arith.addf %68, %74 : vector<8x128xf32>
    %c0_i32 = arith.constant 0 : i32
    %76 = vector.broadcast %c0_i32 : i32 to vector<8x128xi32>
    %77 = arith.cmpi eq, %11, %76 : vector<8x128xi32>
    %cst_30 = arith.constant 0.000000e+00 : f32
    %78 = vector.shape_cast %62 : vector<8x1xf32> to vector<8x1xf32>
    %79 = vector.broadcast %78 : vector<8x1xf32> to vector<8x128xf32>
    %80 = vector.broadcast %cst_30 : f32 to vector<8x128xf32>
    %81 = arith.select %77, %79, %80 : vector<8x128xi1>, vector<8x128xf32>
    %82 = arith.addf %75, %81 : vector<8x128xf32>
    %83 = vector.shape_cast %82 : vector<8x128xf32> to vector<2x4x128xf32>
    %cst_31 = arith.constant dense<0.000000e+00> : vector<2x4xf32>
    %84 = vector.multi_reduction <add>, %83, %cst_31 [2] : vector<2x4x128xf32> to vector<2x4xf32>
    %c0_32 = arith.constant 0 : index
    %c0_33 = arith.constant 0 : index
    %85 = vector.load %arg1[%c0_32, %c0_33] : memref<2x128xf32, #tpu.memory_space<vmem>>, vector<2x128xf32>
    %c0_34 = arith.constant 0 : index
    %c0_35 = arith.constant 0 : index
    %86 = vector.load %arg4[%c0_34, %c0_35] : memref<2x128xf32, #tpu.memory_space<vmem>>, vector<2x128xf32>
    %87 = arith.addf %85, %86 : vector<2x128xf32>
    %c0_36 = arith.constant 0 : index
    %c0_37 = arith.constant 0 : index
    %c0_38 = arith.constant 0 : index
    %88 = vector.load %arg2[%c0_36, %c0_37, %c0_38] : memref<2x2x128xf32, #tpu.memory_space<vmem>>, vector<2x2x128xf32>
    %cst_39 = arith.constant dense<0.000000e+00> : vector<2x128xf32>
    %89 = vector.multi_reduction <add>, %88, %cst_39 [1] : vector<2x2x128xf32> to vector<2x128xf32>
    %90 = arith.addf %87, %89 : vector<2x128xf32>
    %c0_40 = arith.constant 0 : index
    %c0_41 = arith.constant 0 : index
    %c0_42 = arith.constant 0 : index
    %91 = vector.load %arg3[%c0_40, %c0_41, %c0_42] : memref<2x2x128xf32, #tpu.memory_space<vmem>>, vector<2x2x128xf32>
    %cst_43 = arith.constant dense<0.000000e+00> : vector<2x128xf32>
    %92 = vector.multi_reduction <add>, %91, %cst_43 [1] : vector<2x2x128xf32> to vector<2x128xf32>
    %93 = arith.addf %90, %92 : vector<2x128xf32>
    %cst_44 = arith.constant 0.166666672 : f32
    %94 = vector.broadcast %cst_44 : f32 to vector<2x128xf32>
    %95 = arith.mulf %93, %94 : vector<2x128xf32>
    %96 = arith.truncf %95 : vector<2x128xf32> to vector<2x128xbf16>
    %c0_45 = arith.constant 0 : index
    %c0_46 = arith.constant 0 : index
    %97 = vector.load %arg12[%c0_45, %c0_46] : memref<128x256xbf16, #tpu.memory_space<vmem>>, vector<128x256xbf16>
    %cst_47 = arith.constant dense<0.000000e+00> : vector<2x256xf32>
    %98 = tpu.matmul %96, %97, %cst_47 {dimension_numbers = #tpu.dot_dimension_numbers<[1], [0], [0], [1], [0, 0, 1, 1], [], []>} : vector<2x128xbf16>, vector<128x256xbf16>, vector<2x256xf32> -> vector<2x256xf32>
    %c0_48 = arith.constant 0 : index
    %c0_49 = arith.constant 0 : index
    %99 = vector.load %arg13[%c0_48, %c0_49] : memref<1x256xf32, #tpu.memory_space<vmem>>, vector<1x256xf32>
    %100 = vector.broadcast %99 : vector<1x256xf32> to vector<2x256xf32>
    %101 = arith.addf %98, %100 : vector<2x256xf32>
    %102 = arith.truncf %101 : vector<2x256xf32> to vector<2x256xbf16>
    %c0_50 = arith.constant 0 : index
    %c0_51 = arith.constant 0 : index
    %103 = vector.load %arg14[%c0_50, %c0_51] : memref<256x128xbf16, #tpu.memory_space<vmem>>, vector<256x128xbf16>
    %cst_52 = arith.constant dense<0.000000e+00> : vector<2x128xf32>
    %104 = tpu.matmul %102, %103, %cst_52 {dimension_numbers = #tpu.dot_dimension_numbers<[1], [0], [0], [1], [0, 0, 1, 1], [], []>} : vector<2x256xbf16>, vector<256x128xbf16>, vector<2x128xf32> -> vector<2x128xf32>
    %c0_53 = arith.constant 0 : index
    %c0_54 = arith.constant 0 : index
    %105 = vector.load %arg15[%c0_53, %c0_54] : memref<1x128xf32, #tpu.memory_space<vmem>>, vector<1x128xf32>
    %106 = vector.broadcast %105 : vector<1x128xf32> to vector<2x128xf32>
    %107 = arith.addf %104, %106 : vector<2x128xf32>
    %c0_55 = arith.constant 0 : index
    %c0_56 = arith.constant 0 : index
    %108 = vector.load %arg16[%c0_55, %c0_56] : memref<1x128xf32, #tpu.memory_space<vmem>>, vector<1x128xf32>
    %109 = vector.broadcast %108 : vector<1x128xf32> to vector<2x128xf32>
    %110 = arith.mulf %107, %109 : vector<2x128xf32>
    %cst_57 = arith.constant dense<0.000000e+00> : vector<2xf32>
    %111 = vector.multi_reduction <add>, %110, %cst_57 [1] : vector<2x128xf32> to vector<2xf32>
    %112 = vector.shape_cast %111 : vector<2xf32> to vector<2x1xf32>
    %c0_58 = arith.constant 0 : index
    %c0_59 = arith.constant 0 : index
    %113 = vector.load %arg17[%c0_58, %c0_59] : memref<1x1xf32, #tpu.memory_space<vmem>>, vector<1x1xf32>
    %114 = vector.broadcast %113 : vector<1x1xf32> to vector<2x1xf32>
    %115 = arith.addf %112, %114 : vector<2x1xf32>
    %c0_60 = arith.constant 0 : index
    %c0_61 = arith.constant 0 : index
    %116 = vector.load %arg5[%c0_60, %c0_61] : memref<2x128xf32, #tpu.memory_space<vmem>>, vector<2x128xf32>
    %117 = tpu.iota {dimensions = array<i32: 1>} : vector<2x128xi32>
    %cst_62 = arith.constant -1.100000e+01 : f32
    %118 = vector.broadcast %cst_62 : f32 to vector<2x128xf32>
    %119 = arith.cmpf one, %116, %118 : vector<2x128xf32>
    %120 = arith.extui %119 : vector<2x128xi1> to vector<2x128xi32>
    %121 = arith.sitofp %120 : vector<2x128xi32> to vector<2x128xf32>
    %cst_63 = arith.constant dense<0.000000e+00> : vector<2xf32>
    %122 = vector.multi_reduction <add>, %121, %cst_63 [1] : vector<2x128xf32> to vector<2xf32>
    %123 = vector.shape_cast %122 : vector<2xf32> to vector<2x1xf32>
    %cst_64 = arith.constant 1.000000e+30 : f32
    %124 = vector.broadcast %cst_64 : f32 to vector<2x128xf32>
    %125 = arith.select %119, %116, %124 : vector<2x128xi1>, vector<2x128xf32>
    %cst_65 = arith.constant dense<0x7F800000> : vector<2xf32>
    %126 = vector.multi_reduction <minimumf>, %125, %cst_65 [1] : vector<2x128xf32> to vector<2xf32>
    %127 = vector.shape_cast %126 : vector<2xf32> to vector<2x1xf32>
    %cst_66 = arith.constant 0.000000e+00 : f32
    %cst_67 = arith.constant 1.000000e+30 : f32
    %128 = arith.subf %cst_66, %cst_67 : f32
    %129 = vector.broadcast %128 : f32 to vector<2x128xf32>
    %130 = arith.select %119, %116, %129 : vector<2x128xi1>, vector<2x128xf32>
    %cst_68 = arith.constant dense<0xFF800000> : vector<2xf32>
    %131 = vector.multi_reduction <maximumf>, %130, %cst_68 [1] : vector<2x128xf32> to vector<2xf32>
    %132 = vector.shape_cast %131 : vector<2xf32> to vector<2x1xf32>
    %c128_i32 = arith.constant 128 : i32
    %133 = vector.broadcast %c128_i32 : i32 to vector<2x128xi32>
    %134 = arith.select %119, %117, %133 : vector<2x128xi1>, vector<2x128xi32>
    %cst_69 = arith.constant dense<2147483647> : vector<2xi32>
    %135 = vector.multi_reduction <minsi>, %134, %cst_69 [1] : vector<2x128xi32> to vector<2xi32>
    %136 = vector.shape_cast %135 : vector<2xi32> to vector<2x1xi32>
    %c-1_i32 = arith.constant -1 : i32
    %137 = vector.broadcast %c-1_i32 : i32 to vector<2x128xi32>
    %138 = arith.select %119, %117, %137 : vector<2x128xi1>, vector<2x128xi32>
    %cst_70 = arith.constant dense<-2147483648> : vector<2xi32>
    %139 = vector.multi_reduction <maxsi>, %138, %cst_70 [1] : vector<2x128xi32> to vector<2xi32>
    %140 = vector.shape_cast %139 : vector<2xi32> to vector<2x1xi32>
    %141 = vector.broadcast %136 : vector<2x1xi32> to vector<2x128xi32>
    %142 = arith.cmpi eq, %117, %141 : vector<2x128xi32>
    %cst_71 = arith.constant 0.000000e+00 : f32
    %143 = vector.broadcast %cst_71 : f32 to vector<2x128xf32>
    %144 = arith.select %142, %116, %143 : vector<2x128xi1>, vector<2x128xf32>
    %cst_72 = arith.constant dense<0.000000e+00> : vector<2xf32>
    %145 = vector.multi_reduction <add>, %144, %cst_72 [1] : vector<2x128xf32> to vector<2xf32>
    %146 = vector.shape_cast %145 : vector<2xf32> to vector<2x1xf32>
    %147 = vector.broadcast %140 : vector<2x1xi32> to vector<2x128xi32>
    %148 = arith.cmpi eq, %117, %147 : vector<2x128xi32>
    %cst_73 = arith.constant 0.000000e+00 : f32
    %149 = vector.broadcast %cst_73 : f32 to vector<2x128xf32>
    %150 = arith.select %148, %116, %149 : vector<2x128xi1>, vector<2x128xf32>
    %cst_74 = arith.constant dense<0.000000e+00> : vector<2xf32>
    %151 = vector.multi_reduction <add>, %150, %cst_74 [1] : vector<2x128xf32> to vector<2xf32>
    %152 = vector.shape_cast %151 : vector<2xf32> to vector<2x1xf32>
    %cst_75 = arith.constant 0.000000e+00 : f32
    %153 = vector.broadcast %cst_75 : f32 to vector<2x1xf32>
    %154 = arith.cmpf ogt, %123, %153 : vector<2x1xf32>
    %cst_76 = arith.constant 0x7FC00000 : f32
    %155 = vector.broadcast %cst_76 : f32 to vector<2x1xf32>
    %156 = arith.select %154, %127, %155 : vector<2x1xi1>, vector<2x1xf32>
    %cst_77 = arith.constant 0.000000e+00 : f32
    %157 = vector.broadcast %cst_77 : f32 to vector<2x1xf32>
    %158 = arith.cmpf ogt, %123, %157 : vector<2x1xf32>
    %cst_78 = arith.constant 0x7FC00000 : f32
    %159 = vector.broadcast %cst_78 : f32 to vector<2x1xf32>
    %160 = arith.select %158, %132, %159 : vector<2x1xi1>, vector<2x1xf32>
    %cst_79 = arith.constant 1.000000e+00 : f32
    %161 = vector.broadcast %cst_79 : f32 to vector<2x1xf32>
    %162 = arith.cmpf ogt, %123, %161 : vector<2x1xf32>
    %163 = arith.subf %152, %146 : vector<2x1xf32>
    %cst_80 = arith.constant 0.000000e+00 : f32
    %164 = vector.broadcast %cst_80 : f32 to vector<2x1xf32>
    %165 = arith.select %162, %163, %164 : vector<2x1xi1>, vector<2x1xf32>
    %c4_i32 = arith.constant 4 : i32
    %166 = vector.broadcast %c4_i32 : i32 to vector<2x128xi32>
    %167 = arith.cmpi eq, %117, %166 : vector<2x128xi32>
    %cst_81 = arith.constant 0.000000e+00 : f32
    %168 = vector.shape_cast %115 : vector<2x1xf32> to vector<2x1xf32>
    %169 = vector.broadcast %168 : vector<2x1xf32> to vector<2x128xf32>
    %170 = vector.broadcast %cst_81 : f32 to vector<2x128xf32>
    %171 = arith.select %167, %169, %170 : vector<2x128xi1>, vector<2x128xf32>
    %c5_i32 = arith.constant 5 : i32
    %172 = vector.broadcast %c5_i32 : i32 to vector<2x128xi32>
    %173 = arith.cmpi eq, %117, %172 : vector<2x128xi32>
    %cst_82 = arith.constant 0.000000e+00 : f32
    %174 = vector.shape_cast %156 : vector<2x1xf32> to vector<2x1xf32>
    %175 = vector.broadcast %174 : vector<2x1xf32> to vector<2x128xf32>
    %176 = vector.broadcast %cst_82 : f32 to vector<2x128xf32>
    %177 = arith.select %173, %175, %176 : vector<2x128xi1>, vector<2x128xf32>
    %178 = arith.addf %171, %177 : vector<2x128xf32>
    %c6_i32 = arith.constant 6 : i32
    %179 = vector.broadcast %c6_i32 : i32 to vector<2x128xi32>
    %180 = arith.cmpi eq, %117, %179 : vector<2x128xi32>
    %cst_83 = arith.constant 0.000000e+00 : f32
    %181 = vector.shape_cast %160 : vector<2x1xf32> to vector<2x1xf32>
    %182 = vector.broadcast %181 : vector<2x1xf32> to vector<2x128xf32>
    %183 = vector.broadcast %cst_83 : f32 to vector<2x128xf32>
    %184 = arith.select %180, %182, %183 : vector<2x128xi1>, vector<2x128xf32>
    %185 = arith.addf %178, %184 : vector<2x128xf32>
    %c7_i32 = arith.constant 7 : i32
    %186 = vector.broadcast %c7_i32 : i32 to vector<2x128xi32>
    %187 = arith.cmpi eq, %117, %186 : vector<2x128xi32>
    %cst_84 = arith.constant 0.000000e+00 : f32
    %188 = vector.shape_cast %165 : vector<2x1xf32> to vector<2x1xf32>
    %189 = vector.broadcast %188 : vector<2x1xf32> to vector<2x128xf32>
    %190 = vector.broadcast %cst_84 : f32 to vector<2x128xf32>
    %191 = arith.select %187, %189, %190 : vector<2x128xi1>, vector<2x128xf32>
    %192 = arith.addf %185, %191 : vector<2x128xf32>
    %c0_i32_85 = arith.constant 0 : i32
    %193 = vector.broadcast %c0_i32_85 : i32 to vector<2x128xi32>
    %194 = arith.cmpi eq, %117, %193 : vector<2x128xi32>
    %195 = vector.extract_strided_slice %84 {offsets = [0, 0], sizes = [2, 1], strides = [1, 1]} : vector<2x4xf32> to vector<2x1xf32>
    %cst_86 = arith.constant 0.000000e+00 : f32
    %196 = vector.shape_cast %195 : vector<2x1xf32> to vector<2x1xf32>
    %197 = vector.broadcast %196 : vector<2x1xf32> to vector<2x128xf32>
    %198 = vector.broadcast %cst_86 : f32 to vector<2x128xf32>
    %199 = arith.select %194, %197, %198 : vector<2x128xi1>, vector<2x128xf32>
    %200 = arith.addf %192, %199 : vector<2x128xf32>
    %c1_i32 = arith.constant 1 : i32
    %201 = vector.broadcast %c1_i32 : i32 to vector<2x128xi32>
    %202 = arith.cmpi eq, %117, %201 : vector<2x128xi32>
    %203 = vector.extract_strided_slice %84 {offsets = [0, 1], sizes = [2, 1], strides = [1, 1]} : vector<2x4xf32> to vector<2x1xf32>
    %cst_87 = arith.constant 0.000000e+00 : f32
    %204 = vector.shape_cast %203 : vector<2x1xf32> to vector<2x1xf32>
    %205 = vector.broadcast %204 : vector<2x1xf32> to vector<2x128xf32>
    %206 = vector.broadcast %cst_87 : f32 to vector<2x128xf32>
    %207 = arith.select %202, %205, %206 : vector<2x128xi1>, vector<2x128xf32>
    %208 = arith.addf %200, %207 : vector<2x128xf32>
    %c2_i32 = arith.constant 2 : i32
    %209 = vector.broadcast %c2_i32 : i32 to vector<2x128xi32>
    %210 = arith.cmpi eq, %117, %209 : vector<2x128xi32>
    %211 = vector.extract_strided_slice %84 {offsets = [0, 2], sizes = [2, 1], strides = [1, 1]} : vector<2x4xf32> to vector<2x1xf32>
    %cst_88 = arith.constant 0.000000e+00 : f32
    %212 = vector.shape_cast %211 : vector<2x1xf32> to vector<2x1xf32>
    %213 = vector.broadcast %212 : vector<2x1xf32> to vector<2x128xf32>
    %214 = vector.broadcast %cst_88 : f32 to vector<2x128xf32>
    %215 = arith.select %210, %213, %214 : vector<2x128xi1>, vector<2x128xf32>
    %216 = arith.addf %208, %215 : vector<2x128xf32>
    %c3_i32 = arith.constant 3 : i32
    %217 = vector.broadcast %c3_i32 : i32 to vector<2x128xi32>
    %218 = arith.cmpi eq, %117, %217 : vector<2x128xi32>
    %219 = vector.extract_strided_slice %84 {offsets = [0, 3], sizes = [2, 1], strides = [1, 1]} : vector<2x4xf32> to vector<2x1xf32>
    %cst_89 = arith.constant 0.000000e+00 : f32
    %220 = vector.shape_cast %219 : vector<2x1xf32> to vector<2x1xf32>
    %221 = vector.broadcast %220 : vector<2x1xf32> to vector<2x128xf32>
    %222 = vector.broadcast %cst_89 : f32 to vector<2x128xf32>
    %223 = arith.select %218, %221, %222 : vector<2x128xi1>, vector<2x128xf32>
    %224 = arith.addf %216, %223 : vector<2x128xf32>
    %c0_90 = arith.constant 0 : index
    %c0_91 = arith.constant 0 : index
    %225 = vector.load %arg18[%c0_90, %c0_91] : memref<2x128xf32, #tpu.memory_space<vmem>>, vector<2x128xf32>
    tpu.vector_store %arg18[%c0_90, %c0_91], %224 {strides = array<i32>} : memref<2x128xf32, #tpu.memory_space<vmem>>, vector<2x128xf32>,
    return
  }
}

</mosaic_0001>

<bundles_post_ra>
// kernel: model_forward.1
= control target key start
LH: loop header
LB: loop body
LE: loop exit
PB: predicated region body
PF: predicated region fallthrough
CT: control target
= control target key end

     0   :  { %s3576_s0 = inlined_call_operand.vmem [shape: f32[8,128], index: 0, kind: input, shape index: {}]   ;;  %s3577_s1 = inlined_call_operand.vmem [shape: f32[2,128], index: 1, kind: input, shape index: {}]   ;;  %s3578_s2 = inlined_call_operand.vmem [shape: f32[2,2,128], index: 2, kind: input, shape index: {}]   ;;  %s3579_s3 = inlined_call_operand.vmem [shape: f32[2,2,128], index: 3, kind: input, shape index: {}]   ;;  %s3580_s4 = inlined_call_operand.vmem [shape: f32[2,128], index: 4, kind: input, shape index: {}]   ;;  %s3581_s5 = inlined_call_operand.vmem [shape: f32[2,128], index: 5, kind: input, shape index: {}]   ;;  %s3582_s6 = inlined_call_operand.hbm [shape: bf16[128,1152], index: 6, kind: input, shape index: {}]   ;;  %s3583_s7 = inlined_call_operand.vmem [shape: f32[1,1152], index: 7, kind: input, shape index: {}]   ;;  %s3584_s8 = inlined_call_operand.hbm [shape: bf16[1024,256], index: 8, kind: input, shape index: {}]   ;;  %s3585_s9 = inlined_call_operand.hbm [shape: f32[1,256], index: 9, kind: input, shape index: {}]   ;;  %s3586_s10 = inlined_call_operand.vmem [shape: f32[2,1,128], index: 10, kind: input, shape index: {}]   ;;  %s3587_s11 = inlined_call_operand.vmem [shape: f32[2,1,1], index: 11, kind: input, shape index: {}]   ;;  %s3588_s12 = inlined_call_operand.hbm [shape: bf16[128,256], index: 12, kind: input, shape index: {}]   ;;  %s3589_s13 = inlined_call_operand.vmem [shape: f32[1,256], index: 13, kind: input, shape index: {}]   ;;  %s3590_s14 = inlined_call_operand.hbm [shape: bf16[256,128], index: 14, kind: input, shape index: {}]   ;;  %s3591_s15 = inlined_call_operand.vmem [shape: f32[1,128], index: 15, kind: input, shape index: {}]   ;;  %s3592_s16 = inlined_call_operand.vmem [shape: f32[1,128], index: 16, kind: input, shape index: {}]   ;;  %s3593_s17 = inlined_call_operand.<no memory space> [shape: f32[1,1], index: 17, kind: input, shape index: {}]   ;;  %s3594_s18 = inlined_call_operand.vmem [shape: f32[2,128], index: 18, kind: output, shape index: {}]  }
   0x1   :  { %3597 = sst [smem:[#allocation14_spill]] %s3576_s0  ;;  %v23_v0 = vstv %s3593_s17 }
   0x2   :  { %3598 = sst [smem:[#allocation15_spill]] %s3577_s1  ;;  %24 = vst [vmem:[#allocation2] sm:$0x1] %v23_v0 }
   0x3   :  { %3599 = sst [smem:[#allocation16_spill]] %s3578_s2 }
   0x4   :  { %25 = vsyncpa [#allocation4], 0 }
   0x5   :  { %26 = vsyncpa [#allocation6], 0 }
   0x6   :  { %27 = vsyncpa [#allocation9], 0  ;;  %s3197_s29 = smov [#allocation5]   ;;  %s3081_s1 = scalar_lea.hbm %s3584_s8, 16384 }
   0x7   :  { %s59_s30 = sshll.u32 %s3197_s29, 4  ;;  %p3082_p0 = scmp.ne.s32.totalorder %s3584_s8, %s3081_s1  ;;  %s60_s30 = int_to_ptr.vmem [resolvable:$true] %s59_s30 }
   0x8   :  { %p3085_p1 = scmp.lt.u32.totalorder %s3081_s1, %s3584_s8 }
   0xa   :  { %p3087_p2 = pnand %p3085_p1, %p3082_p0 }
   0xc   :  { %3090 = shalt.err (!%p3087_p2)
}
   0xd   :  { %s3091_s17 = scalar_lea.vmem %s60_s30, 16384  ;;  %p3096_p4 = scmp.lt.s32.totalorder %s60_s30, %s60_s30 }
   0xe   :  { %p3092_p3 = scmp.ne.s32.totalorder %s60_s30, %s3091_s17  ;;  %p3097_p5 = scmp.lt.s32.totalorder %s3091_s17, %s3091_s17 }
  0x10   :  { %p3098_p6 = por %p3097_p5, %p3096_p4 }
  0x12   :  { %p3099_p7 = pnand %p3098_p6, %p3092_p3 }
  0x14   :  { %3102 = shalt.err (!%p3099_p7)
}
  0x15   :  { %s3198_s23 = smov 128   ;;  %s3199_s24 = smov 8  }
  0x16   :  { %65 = dma.hbm_to_vmem [thread:$0]  %s3584_s8, 16384, %s60_s30, [#allocation6], %s3198_s23, %s3198_s23, %s3199_s24  }
  0x17   :  { %s3200_s27 = smov [#allocation8]   ;;  %s3201_s29 = smov [#allocation3]  }
  0x18   :  { %s85_s28 = sshll.u32 %s3200_s27, 4  ;;  %s45_s0 = sshll.u32 %s3201_s29, 4  ;;  %s86_s28 = int_to_ptr.vmem [resolvable:$true] %s85_s28  ;;  %s46_s0 = int_to_ptr.vmem [resolvable:$true] %s45_s0 }
  0x19   :  { %s3103_s20 = scalar_lea.hbm %s3588_s12, 2048 }
  0x1a   :  { %p3104_p8 = scmp.ne.s32.totalorder %s3588_s12, %s3103_s20  ;;  %p3107_p9 = scmp.lt.u32.totalorder %s3103_s20, %s3588_s12 }
  0x1c   :  { %p3109_p10 = pnand %p3107_p9, %p3104_p8 }
  0x1e   :  { %3112 = shalt.err (!%p3109_p10)
}
  0x1f   :  { %s3113_s8 = scalar_lea.vmem %s86_s28, 2048  ;;  %p3118_p12 = scmp.lt.s32.totalorder %s86_s28, %s86_s28 }
  0x20   :  { %p3114_p11 = scmp.ne.s32.totalorder %s86_s28, %s3113_s8  ;;  %p3119_p13 = scmp.lt.s32.totalorder %s3113_s8, %s3113_s8 }
  0x22   :  { %p3120_p0 = por %p3119_p13, %p3118_p12 }
  0x24   :  { %p3121_p1 = pnand %p3120_p0, %p3114_p11 }
  0x26   :  { %3124 = shalt.err (!%p3121_p1)
}
  0x27   :  { %91 = dma.hbm_to_vmem [thread:$0]  %s3588_s12, 2048, %s86_s28, [#allocation9], %s3198_s23, %s3198_s23, %s3199_s24  }
  0x28   :  { %s3125_s29 = scalar_lea.hbm %s3582_s6, 9216 }
  0x29   :  { %p3126_p2 = scmp.ne.s32.totalorder %s3582_s6, %s3125_s29  ;;  %p3129_p3 = scmp.lt.u32.totalorder %s3125_s29, %s3582_s6 }
  0x2b   :  { %p3131_p4 = pnand %p3129_p3, %p3126_p2 }
  0x2d   :  { %3134 = shalt.err (!%p3131_p4)
}
  0x2e   :  { %s3135_s22 = scalar_lea.vmem %s46_s0, 9216  ;;  %p3140_p6 = scmp.lt.s32.totalorder %s46_s0, %s46_s0 }
  0x2f   :  { %p3136_p5 = scmp.ne.s32.totalorder %s46_s0, %s3135_s22  ;;  %p3141_p7 = scmp.lt.s32.totalorder %s3135_s22, %s3135_s22 }
  0x31   :  { %p3142_p8 = por %p3141_p7, %p3140_p6 }
  0x33   :  { %p3143_p9 = pnand %p3142_p8, %p3136_p5 }
  0x35   :  { %3146 = shalt.err (!%p3143_p9)
}
  0x36   :  { %s3202_s12 = smov 576   ;;  %s3203_s23 = smov 36  }
  0x37   :  { %51 = dma.hbm_to_vmem [thread:$0]  %s3582_s6, 9216, %s46_s0, [#allocation4], %s3202_s12, %s3202_s12, %s3203_s23  }
  0x38   :  { %s3204_s2 = smov [#allocation7]   ;;  %s3205_s8 = smov [#allocation10]  }
  0x39   :  { %s72_s17 = sshll.u32 %s3204_s2, 4  ;;  %s99_s30 = sshll.u32 %s3205_s8, 4  ;;  %s73_s17 = int_to_ptr.vmem [resolvable:$true] %s72_s17  ;;  %s100_s30 = int_to_ptr.vmem [resolvable:$true] %s99_s30 }
  0x3a   :  { %s3147_s27 = scalar_lea.hbm %s3585_s9, 32 }
  0x3b   :  { %p3148_p10 = scmp.ne.s32.totalorder %s3585_s9, %s3147_s27  ;;  %p3151_p11 = scmp.lt.u32.totalorder %s3147_s27, %s3585_s9 }
  0x3d   :  { %p3153_p12 = pnand %p3151_p11, %p3148_p10 }
  0x3f   :  { %3156 = shalt.err (!%p3153_p12)
}
  0x40   :  { %s3157_s6 = scalar_lea.vmem %s73_s17, 32  ;;  %p3162_p0 = scmp.lt.s32.totalorder %s73_s17, %s73_s17 }
  0x41   :  { %p3158_p13 = scmp.ne.s32.totalorder %s73_s17, %s3157_s6  ;;  %p3163_p1 = scmp.lt.s32.totalorder %s3157_s6, %s3157_s6 }
  0x43   :  { %p3164_p2 = por %p3163_p1, %p3162_p0 }
  0x45   :  { %p3165_p3 = pnand %p3164_p2, %p3158_p13 }
  0x47   :  { %3168 = shalt.err (!%p3165_p3)
}
  0x48   :  { %75 = dma.hbm_to_vmem [thread:$0]  %s3585_s9, 32, %s73_s17, [#allocation6]  }
  0x49   :  { %s3169_s23 = scalar_lea.hbm %s3590_s14, 2048 }
  0x4a   :  { %p3170_p4 = scmp.ne.s32.totalorder %s3590_s14, %s3169_s23  ;;  %p3173_p5 = scmp.lt.u32.totalorder %s3169_s23, %s3590_s14 }
  0x4c   :  { %p3175_p6 = pnand %p3173_p5, %p3170_p4 }
  0x4e   :  { %3178 = shalt.err (!%p3175_p6)
}
  0x4f   :  { %s3179_s25 = scalar_lea.vmem %s100_s30, 2048  ;;  %p3184_p8 = scmp.lt.s32.totalorder %s100_s30, %s100_s30 }
  0x50   :  { %p3180_p7 = scmp.ne.s32.totalorder %s100_s30, %s3179_s25  ;;  %p3185_p9 = scmp.lt.s32.totalorder %s3179_s25, %s3179_s25 }
  0x52   :  { %p3186_p10 = por %p3185_p9, %p3184_p8 }
  0x54   :  { %p3187_p11 = pnand %p3186_p10, %p3180_p7 }
  0x56   :  { %3190 = shalt.err (!%p3187_p11)
}
  0x57   :  { %s3206_s9 = smov 64   ;;  %s3207_s17 = smov 4  }
  0x58   :  { %105 = dma.hbm_to_vmem [thread:$0]  %s3590_s14, 2048, %s100_s30, [#allocation9], %s3206_s9, %s3206_s9, %s3207_s17  }
  0x59   :  { %3191 = dma.done.wait [#allocation4], 9216  }
  0x5a   :  { %3192 = vsyncadd [#allocation4], 4294958080 }
  0x5b   :  { %3193 = dma.done.wait [#allocation6], 16416  }
  0x5c   :  { %3194 = vsyncadd [#allocation6], 4294950880 }
  0x5d   :  { %3195 = dma.done.wait [#allocation9], 4096  }
  0x5e   :  { %3196 = vsyncadd [#allocation9], 4294963200  ;;  %v3208_v1 = vmov 0   ;;  %v2738_v2 = vld [vmem:[#allocation3 + $0x4] ss:$36 sps:$4 sm:$0xff]   ;;  %s3600_s29 = sld [smem:[#allocation14_spill]] }
  0x5f   :  { %659 = vmatprep.mubr.bf16.mxu0 %v3208_v1  ;;  %700 = vmatprep.mubr.bf16.mxu1 %v3208_v1  ;;  %v2740_v3 = vld [vmem:[#allocation3 + $0xc] ss:$36 sps:$4 sm:$0xff]   ;;  %v2742_v4 = vld [vmem:[#allocation3] ss:$36 sps:$4 sm:$0xff]   ;;  %v2746_v7 = vld [vmem:[#allocation3 + $0x54] ss:$36 sps:$4 sm:$0xff]  }
  0x60   :  { %2736 = vset.pattern.permute.xlu0 %v3208_v1  ;;  %2737 = vset.pattern.permute.xlu1 %v3208_v1  ;;  %v2743_v5 = vld [vmem:[#allocation3 + $0x8] ss:$36 sps:$4 sm:$0xff]   ;;  %v2749_v9 = vld [vmem:[#allocation3 + $0x50] ss:$36 sps:$4 sm:$0xff]   ;;  %v2752_v11 = vld [vmem:[#allocation3 + $0x9c] ss:$36 sps:$4 sm:$0xff]  }
  0x61   :  { %627 = vmatprep.subr.bf16.mxu0 %v2738_v2  ;;  %668 = vmatprep.subr.bf16.mxu1 %v2740_v3  ;;  %v2744_v6 = vld [vmem:[#allocation3 + $0x4c] ss:$36 sps:$4 sm:$0xff]   ;;  %v2750_v10 = vld [vmem:[#allocation3 + $0x94] ss:$36 sps:$4 sm:$0xff]   ;;  %v2756_v14 = vld [vmem:[#allocation3 + $0xdc] ss:$36 sps:$4 sm:$0xff]  }
  0x62   :  { %628 = vmatpush1.bf16.msra.mxu0 %v2742_v4  ;;  %669 = vmatpush1.bf16.msra.mxu1 %v2743_v5  ;;  %v2748_v8 = vld [vmem:[#allocation3 + $0x48] ss:$36 sps:$4 sm:$0xff]   ;;  %v2754_v12 = vld [vmem:[#allocation3 + $0x90] ss:$36 sps:$4 sm:$0xff]   ;;  %v2755_v13 = vld [vmem:[#allocation3 + $0x98] ss:$36 sps:$4 sm:$0xff]  }
  0x63   :  { %629 = vmatprep.subr.bf16.mxu0 %v2744_v6  ;;  %670 = vmatprep.subr.bf16.mxu1 %v2746_v7  ;;  %v2758_v15 = vld [vmem:[#allocation3 + $0xe4] ss:$36 sps:$4 sm:$0xff]   ;;  %v2760_v16 = vld [vmem:[#allocation3 + $0xd8] ss:$36 sps:$4 sm:$0xff]   ;;  %v2764_v19 = vld [vmem:[#allocation3 + $0x12c] ss:$36 sps:$4 sm:$0xff]  }
  0x64   :  { %v2761_v17 = vld [vmem:[#allocation3 + $0xe0] ss:$36 sps:$4 sm:$0xff]   ;;  %v2767_v21 = vld [vmem:[#allocation3 + $0x128] ss:$36 sps:$4 sm:$0xff]   ;;  %v2770_v23 = vld [vmem:[#allocation3 + $0x174] ss:$36 sps:$4 sm:$0xff]  }
  0x65   :  { %v2762_v18 = vld [vmem:[#allocation3 + $0x124] ss:$36 sps:$4 sm:$0xff]   ;;  %v2768_v22 = vld [vmem:[#allocation3 + $0x16c] ss:$36 sps:$4 sm:$0xff]   ;;  %v2774_v26 = vld [vmem:[#allocation3 + $0x1b4] ss:$36 sps:$4 sm:$0xff]  }
  0x66   :  { %630 = vmatpush1.bf16.msra.mxu0 %v2748_v8  ;;  %671 = vmatpush1.bf16.msra.mxu1 %v2749_v9  ;;  %v2766_v20 = vld [vmem:[#allocation3 + $0x120] ss:$36 sps:$4 sm:$0xff]   ;;  %v2772_v24 = vld [vmem:[#allocation3 + $0x168] ss:$36 sps:$4 sm:$0xff]   ;;  %v2773_v25 = vld [vmem:[#allocation3 + $0x170] ss:$36 sps:$4 sm:$0xff]  }
  0x67   :  { %631 = vmatprep.subr.bf16.mxu0 %v2750_v10  ;;  %672 = vmatprep.subr.bf16.mxu1 %v2752_v11  ;;  %v2776_v27 = vld [vmem:[#allocation3 + $0x1bc] ss:$36 sps:$4 sm:$0xff]   ;;  %v2778_v28 = vld [vmem:[#allocation3 + $0x1b0] ss:$36 sps:$4 sm:$0xff]   ;;  %v2782_v31 = vld [vmem:[#allocation3 + $0x204] ss:$36 sps:$4 sm:$0xff]  }
  0x68   :  { %v2779_v29 = vld [vmem:[#allocation3 + $0x1b8] ss:$36 sps:$4 sm:$0xff]   ;;  %v2785_v33 = vld [vmem:[#allocation3 + $0x200] ss:$36 sps:$4 sm:$0xff]   ;;  %v2786_v37 = vld [vmem:[#allocation3 + $0x10] ss:$36 sps:$4 sm:$0xff]  }
  0x69   :  { %v2780_v30 = vld [vmem:[#allocation3 + $0x1fc] ss:$36 sps:$4 sm:$0xff]   ;;  %v2788_v35 = vld [vmem:[#allocation3 + $0x14] ss:$36 sps:$4 sm:$0xff]   ;;  %v2815_v41 = vld [vmem:[#allocation3 + $0x64] ss:$36 sps:$4 sm:$0xff]  }
  0x6a   :  { %632 = vmatpush1.bf16.msra.mxu0 %v2754_v12  ;;  %673 = vmatpush1.bf16.msra.mxu1 %v2755_v13  ;;  %v2784_v32 = vld [vmem:[#allocation3 + $0x1f8] ss:$36 sps:$4 sm:$0xff]   ;;  %v2794_v43 = vld [vmem:[#allocation3 + $0xa4] ss:$36 sps:$4 sm:$0xff]   ;;  %v2818_v45 = vld [vmem:[#allocation3 + $0xac] ss:$36 sps:$4 sm:$0xff]  }
  0x6b   :  { %633 = vmatprep.subr.bf16.mxu0 %v2756_v14  ;;  %674 = vmatprep.subr.bf16.mxu1 %v2758_v15  ;;  %v128_v34 = vld [vmem:[%s3600_s29] sm:$0xff]  ;;  %v2797_v47 = vld [vmem:[#allocation3 + $0xec] ss:$36 sps:$4 sm:$0xff]   ;;  %v2821_v49 = vld [vmem:[#allocation3 + $0xf4] ss:$36 sps:$4 sm:$0xff]   ;;  %v3209_v7 = vmov 0.0  }
  0x6c   :  { %v3376_v36 = vpack.c.bf16 %v128_v34, %v128_v34  ;;  %v2791_v38 = vld [vmem:[#allocation3 + $0x5c] ss:$36 sps:$4 sm:$0xff]   ;;  %v2816_v48 = vld [vmem:[#allocation3 + $0xa8] ss:$36 sps:$4 sm:$0xff]   ;;  %v2800_v51 = vld [vmem:[#allocation3 + $0x134] ss:$36 sps:$4 sm:$0xff]  }
  0x6d   :  { %v2812_v39 = vld [vmem:[#allocation3 + $0x1c] ss:$36 sps:$4 sm:$0xff]   ;;  %v2795_v50 = vld [vmem:[#allocation3 + $0xe8] ss:$36 sps:$4 sm:$0xff]   ;;  %v2819_v52 = vld [vmem:[#allocation3 + $0xf0] ss:$36 sps:$4 sm:$0xff]  }
  0x6e   :  { %634 = vmatpush1.bf16.msra.mxu0 %v2760_v16  ;;  %675 = vmatpush1.bf16.msra.mxu1 %v2761_v17  ;;  %v2810_v40 = vld [vmem:[#allocation3 + $0x18] ss:$36 sps:$4 sm:$0xff]   ;;  %v2813_v44 = vld [vmem:[#allocation3 + $0x60] ss:$36 sps:$4 sm:$0xff]   ;;  %v2798_v54 = vld [vmem:[#allocation3 + $0x130] ss:$36 sps:$4 sm:$0xff]  }
  0x6f   :  { %635 = vmatprep.subr.bf16.mxu0 %v2762_v18  ;;  %676 = vmatprep.subr.bf16.mxu1 %v2764_v19  ;;  %v2789_v42 = vld [vmem:[#allocation3 + $0x58] ss:$36 sps:$4 sm:$0xff]   ;;  %v2792_v46 = vld [vmem:[#allocation3 + $0xa0] ss:$36 sps:$4 sm:$0xff]   ;;  %v2830_v61 = vld [vmem:[#allocation3 + $0x1cc] ss:$36 sps:$4 sm:$0xff]  }
  0x70   :  { %v2824_v53 = vld [vmem:[#allocation3 + $0x13c] ss:$36 sps:$4 sm:$0xff]   ;;  %v2827_v57 = vld [vmem:[#allocation3 + $0x184] ss:$36 sps:$4 sm:$0xff]   ;;  %v2809_v63 = vld [vmem:[#allocation3 + $0x20c] ss:$36 sps:$4 sm:$0xff]  }
  0x71   :  { %v2803_v55 = vld [vmem:[#allocation3 + $0x17c] ss:$36 sps:$4 sm:$0xff]   ;;  %v2806_v59 = vld [vmem:[#allocation3 + $0x1c4] ss:$36 sps:$4 sm:$0xff]   ;;  %v2833_v2 = vld [vmem:[#allocation3 + $0x214] ss:$36 sps:$4 sm:$0xff]  }
  0x72   :  { %636 = vmatpush1.bf16.msra.mxu0 %v2766_v20  ;;  %677 = vmatpush1.bf16.msra.mxu1 %v2767_v21  ;;  %v2822_v56 = vld [vmem:[#allocation3 + $0x138] ss:$36 sps:$4 sm:$0xff]   ;;  %v2825_v60 = vld [vmem:[#allocation3 + $0x180] ss:$36 sps:$4 sm:$0xff]   ;;  %v2828_v0 = vld [vmem:[#allocation3 + $0x1c8] ss:$36 sps:$4 sm:$0xff]  }
  0x73   :  { %637 = vmatprep.subr.bf16.mxu0 %v2768_v22  ;;  %678 = vmatprep.subr.bf16.mxu1 %v2770_v23  ;;  %v2801_v58 = vld [vmem:[#allocation3 + $0x178] ss:$36 sps:$4 sm:$0xff]   ;;  %v2804_v62 = vld [vmem:[#allocation3 + $0x1c0] ss:$36 sps:$4 sm:$0xff]   ;;  %v2807_v3 = vld [vmem:[#allocation3 + $0x208] ss:$36 sps:$4 sm:$0xff]  }
  0x74   :  { %v2831_v4 = vld [vmem:[#allocation3 + $0x210] ss:$36 sps:$4 sm:$0xff]   ;;  %v2844_v5 = vld [vmem:[#allocation5 + $0x4] ss:$8 sps:$4 sm:$0xff]   ;;  %v2842_v8 = vld [vmem:[#allocation5] ss:$8 sps:$4 sm:$0xff]  }
  0x75   :  { %v2834_v6 = vld [vmem:[#allocation3 + $0x20] ss:$36 sps:$4 sm:$0xff]   ;;  %v2847_v9 = vld [vmem:[#allocation5 + $0x14] ss:$8 sps:$4 sm:$0xff]   ;;  %v2835_v10 = vld [vmem:[#allocation3 + $0x68] ss:$36 sps:$4 sm:$0xff]  }
  0x76   :  { %638 = vmatpush1.bf16.msra.mxu0 %v2772_v24  ;;  %679 = vmatpush1.bf16.msra.mxu1 %v2773_v25  ;;  %vm3210_vm0 = vmmov 0   ;;  %v2845_v11 = vld [vmem:[#allocation5 + $0x10] ss:$8 sps:$4 sm:$0xff]   ;;  %v2850_v12 = vld [vmem:[#allocation5 + $0x24] ss:$8 sps:$4 sm:$0xff]   ;;  %s3601_s21 = sld [smem:[#allocation16_spill]] }
  0x77   :  { %639 = vmatprep.subr.bf16.mxu0 %v2774_v26  ;;  %680 = vmatprep.subr.bf16.mxu1 %v2776_v27  ;;  %v2836_v13 = vld [vmem:[#allocation3 + $0xb0] ss:$36 sps:$4 sm:$0xff]   ;;  %v2848_v14 = vld [vmem:[#allocation5 + $0x20] ss:$8 sps:$4 sm:$0xff]   ;;  %v2837_v16 = vld [vmem:[#allocation3 + $0xf8] ss:$36 sps:$4 sm:$0xff]  }
  0x78   :  { %v2853_v15 = vld [vmem:[#allocation5 + $0x34] ss:$8 sps:$4 sm:$0xff]   ;;  %v2851_v17 = vld [vmem:[#allocation5 + $0x30] ss:$8 sps:$4 sm:$0xff]   ;;  %v2856_v18 = vld [vmem:[#allocation5 + $0x44] ss:$8 sps:$4 sm:$0xff]  }
  0x79   :  { %v2838_v19 = vld [vmem:[#allocation3 + $0x140] ss:$36 sps:$4 sm:$0xff]   ;;  %v2859_v21 = vld [vmem:[#allocation5 + $0x54] ss:$8 sps:$4 sm:$0xff]   ;;  %v2839_v22 = vld [vmem:[#allocation3 + $0x188] ss:$36 sps:$4 sm:$0xff]  }
  0x7a   :  { %640 = vmatpush1.bf16.msra.mxu0 %v2778_v28  ;;  %681 = vmatpush1.bf16.msra.mxu1 %v2779_v29  ;;  %v2854_v20 = vld [vmem:[#allocation5 + $0x40] ss:$8 sps:$4 sm:$0xff]   ;;  %v2857_v23 = vld [vmem:[#allocation5 + $0x50] ss:$8 sps:$4 sm:$0xff]   ;;  %v2862_v24 = vld [vmem:[#allocation5 + $0x64] ss:$8 sps:$4 sm:$0xff]  }
  0x7b   :  { %641 = vmatprep.subr.bf16.mxu0 %v2780_v30  ;;  %682 = vmatprep.subr.bf16.mxu1 %v2782_v31  ;;  %v2840_v25 = vld [vmem:[#allocation3 + $0x1d0] ss:$36 sps:$4 sm:$0xff]   ;;  %v2860_v26 = vld [vmem:[#allocation5 + $0x60] ss:$8 sps:$4 sm:$0xff]   ;;  %v2841_v28 = vld [vmem:[#allocation3 + $0x218] ss:$36 sps:$4 sm:$0xff]  }
  0x7c   :  { %v2865_v27 = vld [vmem:[#allocation5 + $0x74] ss:$8 sps:$4 sm:$0xff]   ;;  %v2871_v29 = vld [vmem:[#allocation5 + $0x104] ss:$8 sps:$4 sm:$0xff]   ;;  %v2863_v30 = vld [vmem:[#allocation5 + $0x70] ss:$8 sps:$4 sm:$0xff]  }
  0x7d   :  { %v2868_v31 = vld [vmem:[#allocation5 + $0x84] ss:$8 sps:$4 sm:$0xff]   ;;  %v2866_v34 = vld [vmem:[#allocation5 + $0x80] ss:$8 sps:$4 sm:$0xff]   ;;  %vm1893_vm2 = vcmask 1041408   ;;  %s3602_s25 = sld [smem:[#allocation15_spill]] }
  0x7e   :  { %642 = vmatpush1.bf16.msra.mxu0 %v2784_v32  ;;  %683 = vmatpush1.bf16.msra.mxu1 %v2785_v33  ;;  %v2869_v32 = vld [vmem:[#allocation5 + $0x100] ss:$8 sps:$4 sm:$0xff]   ;;  %v2877_v33 = vld [vmem:[#allocation5 + $0x114] ss:$8 sps:$4 sm:$0xff]   ;;  %vm1910_vm3 = vcmask 1041409   ;;  %vm1881_vm13 = vcmask 1043456  }
  0x7f   :  { %709 = vmatprep.subr.bf16.mxu0 %v2788_v35  ;;  %750 = vmatprep.subr.bf16.mxu1 %v2812_v39  ;;  %v2874_v35 = vld [vmem:[#allocation5 + $0x94] ss:$8 sps:$4 sm:$0xff]   ;;  %v2872_v39 = vld [vmem:[#allocation5 + $0x90] ss:$8 sps:$4 sm:$0xff]  }
  0x81   :  { %660 = vmatmul.mubr.bf16.vlgmr.msra.gmra.mrb[0].mxu0 %v3376_v36  ;;  %701 = vmatmul.mubr.bf16.vlgmr.msra.gmra.mrb[0].mxu1 %v3376_v36 }
  0x82   :  { %710 = vmatpush1.bf16.msra.mxu0 %v2786_v37  ;;  %741 = vmatprep.mubr.bf16.mxu0 %v3208_v1  ;;  %v2875_v37 = vld [vmem:[#allocation5 + $0x110] ss:$8 sps:$4 sm:$0xff]  }
  0x83   :  { %711 = vmatprep.subr.bf16.mxu0 %v2791_v38  ;;  %751 = vmatpush1.bf16.msra.mxu1 %v2810_v40  ;;  %v2883_v38 = vld [vmem:[#allocation5 + $0x124] ss:$8 sps:$4 sm:$0xff]  }
  0x84   :  { %782 = vmatprep.mubr.bf16.mxu1 %v3208_v1  ;;  %752 = vmatprep.subr.bf16.mxu1 %v2815_v41  ;;  %v2880_v40 = vld [vmem:[#allocation5 + $0xa4] ss:$8 sps:$4 sm:$0xff]   ;;  %v2881_v41 = vld [vmem:[#allocation5 + $0x120] ss:$8 sps:$4 sm:$0xff]  }
  0x86   :  { %712 = vmatpush1.bf16.msra.mxu0 %v2789_v42  ;;  %v2889_v42 = vld [vmem:[#allocation5 + $0x134] ss:$8 sps:$4 sm:$0xff]  }
  0x87   :  { %713 = vmatprep.subr.bf16.mxu0 %v2794_v43  ;;  %753 = vmatpush1.bf16.msra.mxu1 %v2813_v44  ;;  %v2878_v43 = vld [vmem:[#allocation5 + $0xa0] ss:$8 sps:$4 sm:$0xff]   ;;  %v2886_v44 = vld [vmem:[#allocation5 + $0xb4] ss:$8 sps:$4 sm:$0xff]  }
  0x88   :  { %754 = vmatprep.subr.bf16.mxu1 %v2818_v45  ;;  %v2887_v45 = vld [vmem:[#allocation5 + $0x130] ss:$8 sps:$4 sm:$0xff]  }
  0x8a   :  { %714 = vmatpush1.bf16.msra.mxu0 %v2792_v46  ;;  %v2895_v46 = vld [vmem:[#allocation5 + $0x144] ss:$8 sps:$4 sm:$0xff]  }
  0x8b   :  { %715 = vmatprep.subr.bf16.mxu0 %v2797_v47  ;;  %755 = vmatpush1.bf16.msra.mxu1 %v2816_v48  ;;  %v2892_v47 = vld [vmem:[#allocation5 + $0xc4] ss:$8 sps:$4 sm:$0xff]   ;;  %v2893_v48 = vld [vmem:[#allocation5 + $0x140] ss:$8 sps:$4 sm:$0xff]  }
  0x8c   :  { %756 = vmatprep.subr.bf16.mxu1 %v2821_v49  ;;  %v2901_v49 = vld [vmem:[#allocation5 + $0x154] ss:$8 sps:$4 sm:$0xff]  }
  0x8e   :  { %716 = vmatpush1.bf16.msra.mxu0 %v2795_v50  ;;  %v2890_v50 = vld [vmem:[#allocation5 + $0xc0] ss:$8 sps:$4 sm:$0xff]  }
  0x8f   :  { %717 = vmatprep.subr.bf16.mxu0 %v2800_v51  ;;  %757 = vmatpush1.bf16.msra.mxu1 %v2819_v52  ;;  %v2898_v51 = vld [vmem:[#allocation5 + $0xd4] ss:$8 sps:$4 sm:$0xff]   ;;  %v2899_v52 = vld [vmem:[#allocation5 + $0x150] ss:$8 sps:$4 sm:$0xff]  }
  0x90   :  { %758 = vmatprep.subr.bf16.mxu1 %v2824_v53  ;;  %v2907_v53 = vld [vmem:[#allocation5 + $0x164] ss:$8 sps:$4 sm:$0xff]  }
  0x92   :  { %718 = vmatpush1.bf16.msra.mxu0 %v2798_v54  ;;  %v2896_v54 = vld [vmem:[#allocation5 + $0xd0] ss:$8 sps:$4 sm:$0xff]  }
  0x93   :  { %719 = vmatprep.subr.bf16.mxu0 %v2803_v55  ;;  %759 = vmatpush1.bf16.msra.mxu1 %v2822_v56  ;;  %v2904_v55 = vld [vmem:[#allocation5 + $0xe4] ss:$8 sps:$4 sm:$0xff]   ;;  %v2902_v56 = vld [vmem:[#allocation5 + $0xe0] ss:$8 sps:$4 sm:$0xff]  }
  0x94   :  { %760 = vmatprep.subr.bf16.mxu1 %v2827_v57  ;;  %v2905_v57 = vld [vmem:[#allocation5 + $0x160] ss:$8 sps:$4 sm:$0xff]  }
  0x96   :  { %720 = vmatpush1.bf16.msra.mxu0 %v2801_v58  ;;  %v2913_v58 = vld [vmem:[#allocation5 + $0x174] ss:$8 sps:$4 sm:$0xff]  }
  0x97   :  { %721 = vmatprep.subr.bf16.mxu0 %v2806_v59  ;;  %761 = vmatpush1.bf16.msra.mxu1 %v2825_v60  ;;  %v2910_v59 = vld [vmem:[#allocation5 + $0xf4] ss:$8 sps:$4 sm:$0xff]   ;;  %v2908_v60 = vld [vmem:[#allocation5 + $0xf0] ss:$8 sps:$4 sm:$0xff]  }
  0x98   :  { %762 = vmatprep.subr.bf16.mxu1 %v2830_v61  ;;  %v2911_v61 = vld [vmem:[#allocation5 + $0x170] ss:$8 sps:$4 sm:$0xff]  }
  0x9a   :  { %722 = vmatpush1.bf16.msra.mxu0 %v2804_v62  ;;  %v2916_v62 = vld [vmem:[#allocation5 + $0x184] ss:$8 sps:$4 sm:$0xff]  }
  0x9b   :  { %723 = vmatprep.subr.bf16.mxu0 %v2809_v63  ;;  %763 = vmatpush1.bf16.msra.mxu1 %v2828_v0  ;;  %v2914_v63 = vld [vmem:[#allocation5 + $0x180] ss:$8 sps:$4 sm:$0xff]   ;;  %v2919_v0 = vld [vmem:[#allocation5 + $0x204] ss:$8 sps:$4 sm:$0xff]  }
  0x9c   :  { %764 = vmatprep.subr.bf16.mxu1 %v2833_v2  ;;  %v2922_v2 = vld [vmem:[#allocation5 + $0x194] ss:$8 sps:$4 sm:$0xff]  }
  0x9e   :  { %724 = vmatpush1.bf16.msra.mxu0 %v2807_v3  ;;  %v2920_v3 = vld [vmem:[#allocation5 + $0x190] ss:$8 sps:$4 sm:$0xff]  }
  0x9f   :  { %2702 = vmatprep.subr.bf16.mxu0 %v3209_v7  ;;  %765 = vmatpush1.bf16.msra.mxu1 %v2831_v4  ;;  %v2928_v4 = vld [vmem:[#allocation5 + $0x1a4] ss:$8 sps:$4 sm:$0xff]  }
  0xa0   :  { %1666 = vmatprep.subr.bf16.mxu1 %v2844_v5  ;;  %v2926_v5 = vld [vmem:[#allocation5 + $0x1a0] ss:$8 sps:$4 sm:$0xff]  }
  0xa1   :  { %742 = vmatmul.mubr.bf16.vlgmr.msra.gmra.mrb[4].mxu0 %v3376_v36 }
  0xa2   :  { %2703 = vmatpush3.bf16.msra.mxu0 %v2834_v6  ;;  %2718 = vmatprep.mubr.msk.bf16.mxu0 %vm3210_vm0, %v3209_v7  ;;  %v2934_v6 = vld [vmem:[#allocation5 + $0x1b4] ss:$8 sps:$4 sm:$0xff]  }
  0xa3   :  { %783 = vmatmul.mubr.bf16.vlgmr.msra.gmra.mrb[4].mxu1 %v3376_v36  ;;  %2704 = vmatprep.subr.bf16.mxu0 %v3209_v7 }
  0xa4   :  { %1667 = vmatpush1.bf16.msra.mxu1 %v2842_v8  ;;  %v2932_v8 = vld [vmem:[#allocation5 + $0x1b0] ss:$8 sps:$4 sm:$0xff]  }
  0xa5   :  { %1668 = vmatprep.subr.bf16.mxu1 %v2847_v9  ;;  %v2940_v9 = vld [vmem:[#allocation5 + $0x1c4] ss:$8 sps:$4 sm:$0xff]  }
  0xa6   :  { %2705 = vmatpush3.bf16.msra.mxu0 %v2835_v10  ;;  %v2938_v10 = vld [vmem:[#allocation5 + $0x1c0] ss:$8 sps:$4 sm:$0xff]  }
  0xa7   :  { %2706 = vmatprep.subr.bf16.mxu0 %v3209_v7 }
  0xa8   :  { %1669 = vmatpush1.bf16.msra.mxu1 %v2845_v11  ;;  %v2946_v11 = vld [vmem:[#allocation5 + $0x1d4] ss:$8 sps:$4 sm:$0xff]  }
  0xa9   :  { %1670 = vmatprep.subr.bf16.mxu1 %v2850_v12  ;;  %v2944_v12 = vld [vmem:[#allocation5 + $0x1d0] ss:$8 sps:$4 sm:$0xff]  }
  0xaa   :  { %2707 = vmatpush3.bf16.msra.mxu0 %v2836_v13  ;;  %v2952_v13 = vld [vmem:[#allocation5 + $0x1e4] ss:$8 sps:$4 sm:$0xff]  }
  0xab   :  { %2708 = vmatprep.subr.bf16.mxu0 %v3209_v7 }
  0xac   :  { %1671 = vmatpush1.bf16.msra.mxu1 %v2848_v14  ;;  %v2950_v14 = vld [vmem:[#allocation5 + $0x1e0] ss:$8 sps:$4 sm:$0xff]  }
  0xad   :  { %1672 = vmatprep.subr.bf16.mxu1 %v2853_v15  ;;  %v2958_v15 = vld [vmem:[#allocation5 + $0x1f4] ss:$8 sps:$4 sm:$0xff]  }
  0xae   :  { %2709 = vmatpush3.bf16.msra.mxu0 %v2837_v16  ;;  %v2956_v16 = vld [vmem:[#allocation5 + $0x1f0] ss:$8 sps:$4 sm:$0xff]  }
  0xaf   :  { %2710 = vmatprep.subr.bf16.mxu0 %v3209_v7 }
  0xb0   :  { %1673 = vmatpush1.bf16.msra.mxu1 %v2851_v17  ;;  %v2967_v17 = vld [vmem:[#allocation5 + $0x304] ss:$8 sps:$4 sm:$0xff]  }
  0xb1   :  { %1674 = vmatprep.subr.bf16.mxu1 %v2856_v18  ;;  %v214_v18 = vlaneseq }
  0xb2   :  { %2711 = vmatpush3.bf16.msra.mxu0 %v2838_v19 }
  0xb3   :  { %2712 = vmatprep.subr.bf16.mxu0 %v3209_v7  ;;  %v3394_v19 = vshrl.u32 %v214_v18, 7 }
  0xb4   :  { %1675 = vmatpush1.bf16.msra.mxu1 %v2854_v20 }
  0xb5   :  { %1676 = vmatprep.subr.bf16.mxu1 %v2859_v21  ;;  %v3397_v20 = vsub.s32 0, %v3394_v19  ;;  %v3400_v21 = vsub.s32 2, %v3394_v19 }
  0xb6   :  { %2713 = vmatpush3.bf16.msra.mxu0 %v2839_v22  ;;  %v3405_v22 = vld [vmem:[%s3583_s7] sm:$0xff] }
  0xb7   :  { %2714 = vmatprep.subr.bf16.mxu0 %v3209_v7 }
  0xb8   :  { %1677 = vmatpush1.bf16.msra.mxu1 %v2857_v23  ;;  %v3408_v23 = vsub.s32 1, %v3394_v19 }
  0xb9   :  { %1678 = vmatprep.subr.bf16.mxu1 %v2862_v24  ;;  %v3410_v24 = vand.u32 127, %v214_v18  ;;  %v2962_v18 = vld [vmem:[#allocation5 + $0x280] ss:$8 sps:$4 sm:$0xff]  }
  0xba   :  { %2715 = vmatpush3.bf16.msra.mxu0 %v2840_v25  ;;  %v217_v25 = vrot.slane %v3405_v22, %v3397_v20 }
  0xbb   :  { %2716 = vmatprep.subr.bf16.mxu0 %v3209_v7  ;;  %vm841_vm1 = vcmp.lt.s32.totalorder %v3410_v24, 8  ;;  %vm1870_vm11 = vcmp.eq.s32.totalorder %v3410_v24, 0  ;;  %vm2352_vm15 = vcmp.eq.s32.totalorder %v3410_v24, 5  ;;  %vm2345_vm0 = vcmp.eq.s32.totalorder %v3410_v24, 4 }
  0xbc   :  { %1679 = vmatpush1.bf16.msra.mxu1 %v2860_v26  ;;  %v225_v26 = vrot.slane %v3405_v22, %v3400_v21 }
  0xbd   :  { %1680 = vmatprep.subr.bf16.mxu1 %v2865_v27  ;;  %v221_v27 = vrot.slane %v3405_v22, %v3408_v23 }
  0xbe   :  { %2717 = vmatpush3.bf16.msra.mxu0 %v2841_v28 }
  0xbf   :  { %1707 = vmatprep.subr.bf16.mxu0 %v2871_v29 }
  0xc0   :  { %1681 = vmatpush1.bf16.msra.mxu1 %v2863_v30 }
  0xc1   :  { %2719 = vmatmul.mubr.bf16.vlgmr.msra.gmra.mrb[8].mxu0 %v3376_v36  ;;  %1682 = vmatprep.subr.bf16.mxu1 %v2868_v31  ;;  %v2884_v36 = vld [vmem:[#allocation5 + $0xb0] ss:$8 sps:$4 sm:$0xff]  }
  0xc2   :  { %1708 = vmatpush1.bf16.msra.mxu0 %v2869_v32 }
  0xc3   :  { %1709 = vmatprep.subr.bf16.mxu0 %v2877_v33 }
  0xc4   :  { %1683 = vmatpush1.bf16.msra.mxu1 %v2866_v34 }
  0xc5   :  { %1684 = vmatprep.subr.bf16.mxu1 %v2874_v35 }
  0xc6   :  { %1710 = vmatpush1.bf16.msra.mxu0 %v2875_v37 }
  0xc7   :  { %1711 = vmatprep.subr.bf16.mxu0 %v2883_v38 }
  0xc8   :  { %1685 = vmatpush1.bf16.msra.mxu1 %v2872_v39 }
  0xc9   :  { %1686 = vmatprep.subr.bf16.mxu1 %v2880_v40 }
  0xca   :  { %1712 = vmatpush1.bf16.msra.mxu0 %v2881_v41 }
  0xcb   :  { %1713 = vmatprep.subr.bf16.mxu0 %v2889_v42 }
  0xcc   :  { %1687 = vmatpush1.bf16.msra.mxu1 %v2878_v43 }
  0xcd   :  { %1688 = vmatprep.subr.bf16.mxu1 %v2886_v44  ;;  %v2917_v44 = vld [vmem:[#allocation5 + $0x200] ss:$8 sps:$4 sm:$0xff]  }
  0xce   :  { %1714 = vmatpush1.bf16.msra.mxu0 %v2887_v45 }
  0xcf   :  { %1715 = vmatprep.subr.bf16.mxu0 %v2895_v46  ;;  %v2925_v46 = vld [vmem:[#allocation5 + $0x214] ss:$8 sps:$4 sm:$0xff]  }
  0xd0   :  { %1689 = vmatpush1.bf16.msra.mxu1 %v2884_v36  ;;  %v2923_v36 = vld [vmem:[#allocation5 + $0x210] ss:$8 sps:$4 sm:$0xff]  }
  0xd1   :  { %1690 = vmatprep.subr.bf16.mxu1 %v2892_v47  ;;  %v2931_v47 = vld [vmem:[#allocation5 + $0x224] ss:$8 sps:$4 sm:$0xff]  }
  0xd2   :  { %1716 = vmatpush1.bf16.msra.mxu0 %v2893_v48  ;;  %v2929_v48 = vld [vmem:[#allocation5 + $0x220] ss:$8 sps:$4 sm:$0xff]  }
  0xd3   :  { %1717 = vmatprep.subr.bf16.mxu0 %v2901_v49  ;;  %v2937_v49 = vld [vmem:[#allocation5 + $0x234] ss:$8 sps:$4 sm:$0xff]  }
  0xd4   :  { %1691 = vmatpush1.bf16.msra.mxu1 %v2890_v50  ;;  %v2935_v50 = vld [vmem:[#allocation5 + $0x230] ss:$8 sps:$4 sm:$0xff]  }
  0xd5   :  { %1692 = vmatprep.subr.bf16.mxu1 %v2898_v51  ;;  %v2943_v51 = vld [vmem:[#allocation5 + $0x244] ss:$8 sps:$4 sm:$0xff]  }
  0xd6   :  { %1718 = vmatpush1.bf16.msra.mxu0 %v2899_v52  ;;  %v3423_v52 = vsub.s32 3, %v3394_v19 }
  0xd7   :  { %1719 = vmatprep.subr.bf16.mxu0 %v2907_v53  ;;  %v2941_v53 = vld [vmem:[#allocation5 + $0x240] ss:$8 sps:$4 sm:$0xff]  }
  0xd8   :  { %1693 = vmatpush1.bf16.msra.mxu1 %v2896_v54  ;;  %v2949_v54 = vld [vmem:[#allocation5 + $0x254] ss:$8 sps:$4 sm:$0xff]  }
  0xd9   :  { %1694 = vmatprep.subr.bf16.mxu1 %v2904_v55  ;;  %v229_v55 = vrot.slane %v3405_v22, %v3423_v52 }
  0xda   :  { %1720 = vmatpush1.bf16.msra.mxu0 %v2905_v57  ;;  %v232_v57 = vsub.s32 4, %v3394_v19 }
  0xdb   :  { %1721 = vmatprep.subr.bf16.mxu0 %v2913_v58  ;;  %v2955_v58 = vld [vmem:[#allocation5 + $0x264] ss:$8 sps:$4 sm:$0xff]  }
  0xdc   :  { %1695 = vmatpush1.bf16.msra.mxu1 %v2902_v56  ;;  %v2947_v56 = vld [vmem:[#allocation5 + $0x250] ss:$8 sps:$4 sm:$0xff]  }
  0xdd   :  { %1696 = vmatprep.subr.bf16.mxu1 %v2910_v59  ;;  %v240_v59 = vsub.s32 6, %v3394_v19 }
  0xde   :  { %1722 = vmatpush1.bf16.msra.mxu0 %v2911_v61  ;;  %v2953_v61 = vld [vmem:[#allocation5 + $0x260] ss:$8 sps:$4 sm:$0xff]  }
  0xdf   :  { %1723 = vmatprep.subr.bf16.mxu0 %v2916_v62  ;;  %v233_v62 = vrot.slane %v3405_v22, %v232_v57  ;;  %v3001_v57 = vld [vmem:[#allocation5 + $0x360] ss:$8 sps:$4 sm:$0xff]  }
  0xe0   :  { %1697 = vmatpush1.bf16.msra.mxu1 %v2908_v60 }
  0xe1   :  { %1748 = vmatprep.subr.bf16.mxu1 %v2919_v0  ;;  %v241_v0 = vrot.slane %v3405_v22, %v240_v59  ;;  %v3009_v59 = vld [vmem:[#allocation5 + $0x374] ss:$8 sps:$4 sm:$0xff]  }
  0xe2   :  { %1724 = vmatpush1.bf16.msra.mxu0 %v2914_v63  ;;  %v2961_v63 = vld [vmem:[#allocation5 + $0x274] ss:$8 sps:$4 sm:$0xff]  }
  0xe3   :  { %1725 = vmatprep.subr.bf16.mxu0 %v2922_v2 }
  0xe6   :  { %1726 = vmatpush1.bf16.msra.mxu0 %v2920_v3 }
  0xe7   :  { %1727 = vmatprep.subr.bf16.mxu0 %v2928_v4 }
  0xea   :  { %1728 = vmatpush1.bf16.msra.mxu0 %v2926_v5  ;;  %v2959_v5 = vld [vmem:[#allocation5 + $0x270] ss:$8 sps:$4 sm:$0xff]  }
  0xeb   :  { %1729 = vmatprep.subr.bf16.mxu0 %v2934_v6 }
  0xee   :  { %1730 = vmatpush1.bf16.msra.mxu0 %v2932_v8  ;;  %v2964_v8 = vld [vmem:[#allocation5 + $0x284] ss:$8 sps:$4 sm:$0xff]  }
  0xef   :  { %1731 = vmatprep.subr.bf16.mxu0 %v2940_v9 }
  0xf2   :  { %1732 = vmatpush1.bf16.msra.mxu0 %v2938_v10 }
  0xf3   :  { %1733 = vmatprep.subr.bf16.mxu0 %v2946_v11 }
  0xf6   :  { %1734 = vmatpush1.bf16.msra.mxu0 %v2944_v12 }
  0xf7   :  { %1735 = vmatprep.subr.bf16.mxu0 %v2952_v13 }
  0xfa   :  { %1736 = vmatpush1.bf16.msra.mxu0 %v2950_v14 }
  0xfb   :  { %1737 = vmatprep.subr.bf16.mxu0 %v2958_v15 }
  0xfe   :  { %1738 = vmatpush1.bf16.msra.mxu0 %v2956_v16 }
  0xff   :  { %1789 = vmatprep.subr.bf16.mxu0 %v2967_v17 }
 0x154   :  { %v661_v28 = vpop.f32.mrb[0].mxu0  ;;  %v702_v29 = vpop.f32.mrb[0].mxu1 }
 0x155   :  { %v662_v30 = vadd.f32 %v661_v28, %v217_v25  ;;  %v703_v31 = vadd.f32 %v702_v29, %v225_v26  ;;  %v663_v32 = vpop.f32.mrb[1].mxu0  ;;  %v704_v33 = vpop.f32.mrb[1].mxu1  ;;  %v2965_v25 = vld [vmem:[#allocation5 + $0x300] ss:$8 sps:$4 sm:$0xff]   ;;  %v2970_v28 = vld [vmem:[#allocation5 + $0x294] ss:$8 sps:$4 sm:$0xff]  }
 0x156   :  { %v664_v34 = vadd.f32 %v663_v32, %v221_v27  ;;  %v665_v35 = vpop.f32.mrb[2].mxu0  ;;  %v706_v37 = vpop.f32.mrb[2].mxu1  ;;  %v705_v60 = vadd.f32 %v704_v33, %v229_v55  ;;  %v2973_v29 = vld [vmem:[#allocation5 + $0x314] ss:$8 sps:$4 sm:$0xff]   ;;  %v2971_v32 = vld [vmem:[#allocation5 + $0x310] ss:$8 sps:$4 sm:$0xff]  }
 0x157   :  { %v832_v38 = vmax.f32 %v703_v31, 0.0  ;;  %v666_v39 = vpop.f32.mrb[3].mxu0  ;;  %v3419_v40 = vsel %vm841_vm1, %v662_v30, -1e+30  ;;  %v707_v41 = vpop.f32.mrb[3].mxu1  ;;  %vm2355_vm1 = vcmp.eq.s32.totalorder %v3410_v24, 6 }
 0x158   :  { %v831_v42 = vmax.f32 %v664_v34, 0.0  ;;  %843 = vmax.xlane.f32.xlu0 %v3419_v40  ;;  %v833_v3 = vmax.f32 %v705_v60, 0.0  ;;  %v2968_v31 = vld [vmem:[#allocation5 + $0x290] ss:$8 sps:$4 sm:$0xff]   ;;  %v2976_v33 = vld [vmem:[#allocation5 + $0x2a4] ss:$8 sps:$4 sm:$0xff]  }
 0x159   :  { %v879_v43 = vpack.c.bf16 %v832_v38, %v832_v38  ;;  %v2979_v34 = vld [vmem:[#allocation5 + $0x324] ss:$8 sps:$4 sm:$0xff]   ;;  %v2974_v35 = vld [vmem:[#allocation5 + $0x2a0] ss:$8 sps:$4 sm:$0xff]   ;;  %v2982_v38 = vld [vmem:[#allocation5 + $0x2b4] ss:$8 sps:$4 sm:$0xff]  }
 0x15a   :  { %v878_v45 = vpack.c.bf16 %v831_v42, %v831_v42  ;;  %v880_v15 = vpack.c.bf16 %v833_v3, %v833_v3  ;;  %v2977_v37 = vld [vmem:[#allocation5 + $0x320] ss:$8 sps:$4 sm:$0xff]   ;;  %v2985_v39 = vld [vmem:[#allocation5 + $0x334] ss:$8 sps:$4 sm:$0xff]   ;;  %v2980_v41 = vld [vmem:[#allocation5 + $0x2b0] ss:$8 sps:$4 sm:$0xff]  }
 0x15b   :  { %1698 = vmatprep.mubr.bf16.mxu1 %v879_v43  ;;  %v2983_v42 = vld [vmem:[#allocation5 + $0x330] ss:$8 sps:$4 sm:$0xff]   ;;  %v2988_v43 = vld [vmem:[#allocation5 + $0x2c4] ss:$8 sps:$4 sm:$0xff]  }
 0x15c   :  { %1699 = vmatmul.mubr.bf16.vlgmr.msra.gmra.mrb[8].mxu1 %v878_v45  ;;  %v236_v45 = vsub.s32 5, %v3394_v19  ;;  %v2428_v60 = vld [vmem:[%s3583_s7 + $0x8] ss:$0 sm:$0xff] }
 0x15d   :  { %1749 = vmatpush1.bf16.msra.mxu1 %v2917_v44  ;;  %v2991_v44 = vld [vmem:[#allocation5 + $0x344] ss:$8 sps:$4 sm:$0xff]  }
 0x15e   :  { %1750 = vmatprep.subr.bf16.mxu1 %v2925_v46  ;;  %v2986_v46 = vld [vmem:[#allocation5 + $0x2c0] ss:$8 sps:$4 sm:$0xff]  }
 0x161   :  { %1751 = vmatpush1.bf16.msra.mxu1 %v2923_v36  ;;  %v2989_v36 = vld [vmem:[#allocation5 + $0x340] ss:$8 sps:$4 sm:$0xff]  }
 0x162   :  { %1752 = vmatprep.subr.bf16.mxu1 %v2931_v47  ;;  %v2994_v47 = vld [vmem:[#allocation5 + $0x2d4] ss:$8 sps:$4 sm:$0xff]  }
 0x165   :  { %1753 = vmatpush1.bf16.msra.mxu1 %v2929_v48  ;;  %v2997_v48 = vld [vmem:[#allocation5 + $0x354] ss:$8 sps:$4 sm:$0xff]  }
 0x166   :  { %1754 = vmatprep.subr.bf16.mxu1 %v2937_v49  ;;  %v237_v49 = vrot.slane %v3405_v22, %v236_v45  ;;  %v3040_v45 = vld [vmem:[#allocation8 + $0x20] ss:$8 sps:$4 sm:$0xff]  }
 0x169   :  { %1755 = vmatpush1.bf16.msra.mxu1 %v2935_v50  ;;  %v2992_v50 = vld [vmem:[#allocation5 + $0x2d0] ss:$8 sps:$4 sm:$0xff]  }
 0x16a   :  { %1756 = vmatprep.subr.bf16.mxu1 %v2943_v51  ;;  %v2995_v51 = vld [vmem:[#allocation5 + $0x350] ss:$8 sps:$4 sm:$0xff]  }
 0x16d   :  { %1757 = vmatpush1.bf16.msra.mxu1 %v2941_v53  ;;  %v3000_v53 = vld [vmem:[#allocation5 + $0x2e4] ss:$8 sps:$4 sm:$0xff]  }
 0x16e   :  { %1758 = vmatprep.subr.bf16.mxu1 %v2949_v54  ;;  %v3003_v54 = vld [vmem:[#allocation5 + $0x364] ss:$8 sps:$4 sm:$0xff]  }
 0x171   :  { %1759 = vmatpush1.bf16.msra.mxu1 %v2947_v56  ;;  %v2998_v56 = vld [vmem:[#allocation5 + $0x2e0] ss:$8 sps:$4 sm:$0xff]  }
 0x172   :  { %1760 = vmatprep.subr.bf16.mxu1 %v2955_v58  ;;  %v3006_v58 = vld [vmem:[#allocation5 + $0x2f4] ss:$8 sps:$4 sm:$0xff]  }
 0x174   :  { %v743_v2 = vpop.f32.mrb[4].mxu0 }
 0x175   :  { %v744_v4 = vadd.f32 %v743_v2, %v233_v62  ;;  %1761 = vmatpush1.bf16.msra.mxu1 %v2953_v61  ;;  %v3431_v6 = vpop.f32.mrb[5].mxu0 }
 0x176   :  { %1762 = vmatprep.subr.bf16.mxu1 %v2961_v63  ;;  %v784_v9 = vpop.f32.mrb[4].mxu1  ;;  %v747_v10 = vpop.f32.mrb[6].mxu0  ;;  %v746_v55 = vadd.f32 %v3431_v6, %v237_v49  ;;  %v3004_v63 = vld [vmem:[#allocation5 + $0x2f0] ss:$8 sps:$4 sm:$0xff]  }
 0x177   :  { %v834_v11 = vmax.f32 %v744_v4, 0.0  ;;  %v785_v12 = vadd.f32 %v784_v9, %v241_v0  ;;  %v748_v13 = vpop.f32.mrb[7].mxu0  ;;  %v3433_v14 = vpop.f32.mrb[5].mxu1  ;;  %v3007_v0 = vld [vmem:[#allocation5 + $0x370] ss:$8 sps:$4 sm:$0xff]  }
 0x178   :  { %v788_v16 = vpop.f32.mrb[6].mxu1  ;;  %v835_v61 = vmax.f32 %v746_v55, 0.0  ;;  %v3012_v4 = vld [vmem:[#allocation5 + $0x384] ss:$8 sps:$4 sm:$0xff]   ;;  %v3010_v10 = vld [vmem:[#allocation5 + $0x380] ss:$8 sps:$4 sm:$0xff]  }
 0x179   :  { %v881_v17 = vpack.c.bf16 %v834_v11, %v834_v11  ;;  %1763 = vmatpush1.bf16.msra.mxu1 %v2959_v5  ;;  %v836_v26 = vmax.f32 %v785_v12, 0.0  ;;  %v789_v27 = vpop.f32.mrb[7].mxu1  ;;  %v3015_v12 = vld [vmem:[#allocation5 + $0x394] ss:$8 sps:$4 sm:$0xff]   ;;  %v3013_v13 = vld [vmem:[#allocation5 + $0x390] ss:$8 sps:$4 sm:$0xff]  }
 0x17a   :  { %1764 = vmatprep.subr.bf16.mxu1 %v2964_v8  ;;  %v882_v9 = vpack.c.bf16 %v835_v61, %v835_v61  ;;  %v3016_v16 = vld [vmem:[#allocation5 + $0x3a0] ss:$8 sps:$4 sm:$0xff]  }
 0x17b   :  { %1739 = vmatprep.mubr.bf16.mxu0 %v881_v17  ;;  %v883_v30 = vpack.c.bf16 %v836_v26, %v836_v26  ;;  %v3021_v17 = vld [vmem:[#allocation5 + $0x3b4] ss:$8 sps:$4 sm:$0xff]   ;;  %v244_v26 = vsub.s32 7, %v3394_v19  ;;  %v3022_v27 = vld [vmem:[#allocation5 + $0x3c0] ss:$8 sps:$4 sm:$0xff]  }
 0x17c   :  { %1740 = vmatmul.mubr.bf16.vlgmr.msra.gmra.mrb[12].mxu0 %v880_v15  ;;  %v3018_v15 = vld [vmem:[#allocation5 + $0x3a4] ss:$8 sps:$4 sm:$0xff]  }
 0x17d   :  { %1765 = vmatpush1.bf16.msra.mxu1 %v2962_v18  ;;  %1790 = vmatpush1.bf16.msra.mxu0 %v2965_v25  ;;  %v3019_v18 = vld [vmem:[#allocation5 + $0x3b0] ss:$8 sps:$4 sm:$0xff]   ;;  %v3024_v25 = vld [vmem:[#allocation5 + $0x3c4] ss:$8 sps:$4 sm:$0xff]  }
 0x17e   :  { %1766 = vmatprep.subr.bf16.mxu1 %v2970_v28  ;;  %1791 = vmatprep.subr.bf16.mxu0 %v2973_v29  ;;  %v3027_v28 = vld [vmem:[#allocation5 + $0x3d4] ss:$8 sps:$4 sm:$0xff]   ;;  %v245_v29 = vrot.slane %v3405_v22, %v244_v26 }
 0x17f   :  { %1780 = vmatprep.mubr.bf16.mxu1 %v883_v30  ;;  %v3030_v30 = vld [vmem:[#allocation5 + $0x3e4] ss:$8 sps:$4 sm:$0xff]  }
 0x181   :  { %1767 = vmatpush1.bf16.msra.mxu1 %v2968_v31  ;;  %1792 = vmatpush1.bf16.msra.mxu0 %v2971_v32  ;;  %v787_v31 = vadd.f32 %v3433_v14, %v245_v29  ;;  %v3028_v32 = vld [vmem:[#allocation5 + $0x3e0] ss:$8 sps:$4 sm:$0xff]  }
 0x182   :  { %1768 = vmatprep.subr.bf16.mxu1 %v2976_v33  ;;  %1793 = vmatprep.subr.bf16.mxu0 %v2979_v34  ;;  %v3033_v33 = vld [vmem:[#allocation5 + $0x3f4] ss:$8 sps:$4 sm:$0xff]   ;;  %v3036_v14 = vld [vmem:[#allocation8 + $0x4] ss:$8 sps:$4 sm:$0xff]  }
 0x183   :  { %v837_v34 = vmax.f32 %v787_v31, 0.0 }
 0x185   :  { %1769 = vmatpush1.bf16.msra.mxu1 %v2974_v35  ;;  %1794 = vmatpush1.bf16.msra.mxu0 %v2977_v37  ;;  %v3031_v35 = vld [vmem:[#allocation5 + $0x3f0] ss:$8 sps:$4 sm:$0xff]   ;;  %v884_v19 = vpack.c.bf16 %v837_v34, %v837_v34 }
 0x186   :  { %1770 = vmatprep.subr.bf16.mxu1 %v2982_v38  ;;  %1795 = vmatprep.subr.bf16.mxu0 %v2985_v39 }
 0x189   :  { %1771 = vmatpush1.bf16.msra.mxu1 %v2980_v41  ;;  %1796 = vmatpush1.bf16.msra.mxu0 %v2983_v42  ;;  %v3034_v41 = vld [vmem:[#allocation8] ss:$8 sps:$4 sm:$0xff]   ;;  %v3039_v42 = vld [vmem:[#allocation8 + $0x14] ss:$8 sps:$4 sm:$0xff]  }
 0x18a   :  { %1772 = vmatprep.subr.bf16.mxu1 %v2988_v43  ;;  %1797 = vmatprep.subr.bf16.mxu0 %v2991_v44  ;;  %v3037_v43 = vld [vmem:[#allocation8 + $0x10] ss:$8 sps:$4 sm:$0xff]   ;;  %v3042_v44 = vld [vmem:[#allocation8 + $0x24] ss:$8 sps:$4 sm:$0xff]  }
 0x18d   :  { %1773 = vmatpush1.bf16.msra.mxu1 %v2986_v46  ;;  %1798 = vmatpush1.bf16.msra.mxu0 %v2989_v36  ;;  %v3045_v46 = vld [vmem:[#allocation8 + $0x34] ss:$8 sps:$4 sm:$0xff]   ;;  %v3043_v36 = vld [vmem:[#allocation8 + $0x30] ss:$8 sps:$4 sm:$0xff]  }
 0x18e   :  { %1774 = vmatprep.subr.bf16.mxu1 %v2994_v47  ;;  %1799 = vmatprep.subr.bf16.mxu0 %v2997_v48  ;;  %v3046_v47 = vld [vmem:[#allocation8 + $0x40] ss:$8 sps:$4 sm:$0xff]  }
 0x191   :  { %1775 = vmatpush1.bf16.msra.mxu1 %v2992_v50  ;;  %1800 = vmatpush1.bf16.msra.mxu0 %v2995_v51 }
 0x192   :  { %1776 = vmatprep.subr.bf16.mxu1 %v3000_v53  ;;  %1801 = vmatprep.subr.bf16.mxu0 %v3003_v54  ;;  %v1014_v53 = vld [vmem:[#allocation7] sm:$0x3] }
 0x193   :  { %v1019_v54 = vrot.slane %v1014_v53, %v3397_v20  ;;  %v1023_v55 = vrot.slane %v1014_v53, %v3408_v23 }
 0x194   :  { %v825_v62 = vpop.f32.mrb[8].mxu0 }
 0x195   :  { %1777 = vmatpush1.bf16.msra.mxu1 %v2998_v56  ;;  %1802 = vmatpush1.bf16.msra.mxu0 %v3001_v57  ;;  %v826_v2 = vadd.f32 %v2428_v60, %v825_v62  ;;  %v2720_v3 = vpop.f32.mrb[9].mxu0 }
 0x196   :  { %1778 = vmatprep.subr.bf16.mxu1 %v3006_v58  ;;  %1803 = vmatprep.subr.bf16.mxu0 %v3009_v59  ;;  %v828_v5 = vpop.f32.mrb[10].mxu0 }
 0x197   :  { %v838_v6 = vmax.f32 %v826_v2, 0.0  ;;  %v2721_v8 = vpop.f32.mrb[11].mxu0 }
 0x199   :  { %1779 = vmatpush1.bf16.msra.mxu1 %v3004_v63  ;;  %1804 = vmatpush1.bf16.msra.mxu0 %v3007_v0  ;;  %v885_v11 = vpack.c.bf16 %v838_v6, %v838_v6 }
 0x19a   :  { %1805 = vmatprep.subr.bf16.mxu0 %v3012_v4  ;;  %2045 = vmatprep.subr.bf16.mxu1 %v3036_v14 }
 0x19b   :  { %1821 = vmatprep.mubr.bf16.mxu0 %v885_v11 }
 0x19c   :  { %1781 = vmatmul.mubr.bf16.vlgmr.msra.gmra.mrb[12].mxu1 %v882_v9 }
 0x19d   :  { %1806 = vmatpush1.bf16.msra.mxu0 %v3010_v10  ;;  %2077 = vmatprep.mubr.bf16.mxu1 %v3208_v1  ;;  %v3025_v1 = vld [vmem:[#allocation5 + $0x3d0] ss:$8 sps:$4 sm:$0xff]  }
 0x19e   :  { %1807 = vmatprep.subr.bf16.mxu0 %v3015_v12  ;;  %2046 = vmatpush1.bf16.msra.mxu1 %v3034_v41 }
 0x19f   :  { %2047 = vmatprep.subr.bf16.mxu1 %v3039_v42 }
 0x1a1   :  { %1808 = vmatpush1.bf16.msra.mxu0 %v3013_v13 }
 0x1a2   :  { %1809 = vmatprep.subr.bf16.mxu0 %v3018_v15  ;;  %2048 = vmatpush1.bf16.msra.mxu1 %v3037_v43 }
 0x1a3   :  { %2049 = vmatprep.subr.bf16.mxu1 %v3042_v44  ;;  %v3051_v44 = vld [vmem:[#allocation8 + $0x54] ss:$8 sps:$4 sm:$0xff]  }
 0x1a5   :  { %1810 = vmatpush1.bf16.msra.mxu0 %v3016_v16 }
 0x1a6   :  { %1811 = vmatprep.subr.bf16.mxu0 %v3021_v17  ;;  %2050 = vmatpush1.bf16.msra.mxu1 %v3040_v45  ;;  %v3049_v45 = vld [vmem:[#allocation8 + $0x50] ss:$8 sps:$4 sm:$0xff]  }
 0x1a7   :  { %2051 = vmatprep.subr.bf16.mxu1 %v3045_v46  ;;  %v3054_v46 = vld [vmem:[#allocation8 + $0x64] ss:$8 sps:$4 sm:$0xff]  }
 0x1a9   :  { %1812 = vmatpush1.bf16.msra.mxu0 %v3019_v18  ;;  %v1891_v18 = vld [vmem:[%s3601_s21] sm:$0x3] }
 0x1aa   :  { %1813 = vmatprep.subr.bf16.mxu0 %v3024_v25  ;;  %2052 = vmatpush1.bf16.msra.mxu1 %v3043_v36  ;;  %v1892_v25 = vld [vmem:[%s3601_s21 + $0x2] sm:$0x3]  ;;  %v1894_v26 = vsel %vm1893_vm2, %v1891_v18, 0.0  ;;  %v3062_v18 = vld [vmem:[#allocation10 + $0x50] sm:$0xff]  }
 0x1ad   :  { %1814 = vmatpush1.bf16.msra.mxu0 %v3022_v27  ;;  %v1901_v27 = vsel %vm1893_vm2, %v1892_v25, 0.0  ;;  %v3063_v25 = vld [vmem:[#allocation10 + $0x10] sm:$0xff]  }
 0x1ae   :  { %1815 = vmatprep.subr.bf16.mxu0 %v3027_v28  ;;  %v1895_v28 = vrot.slane %v1894_v26, 4  ;;  %v1902_v29 = vrot.slane %v1901_v27, 4 }
 0x1b0   :  { %v1903_v34 = vadd.f32 %v1902_v29, %v1901_v27  ;;  %v3065_v27 = vld [vmem:[#allocation10 + $0x18] sm:$0xff]   ;;  %v3067_v29 = vld [vmem:[#allocation10 + $0x20] sm:$0xff]  }
 0x1b1   :  { %1816 = vmatpush1.bf16.msra.mxu0 %v3025_v1  ;;  %v1914_v1 = vld [vmem:[%s3579_s3] sm:$0x3] }
 0x1b2   :  { %1817 = vmatprep.subr.bf16.mxu0 %v3030_v30  ;;  %v1915_v30 = vld [vmem:[%s3579_s3 + $0x2] sm:$0x3]  ;;  %v1916_v31 = vsel %vm1893_vm2, %v1914_v1, 0.0  ;;  %v3068_v1 = vld [vmem:[#allocation10 + $0x68] sm:$0xff]  }
 0x1b5   :  { %1818 = vmatpush1.bf16.msra.mxu0 %v3028_v32  ;;  %v1923_v32 = vsel %vm1893_vm2, %v1915_v30, 0.0  ;;  %v3069_v30 = vld [vmem:[#allocation10 + $0x28] sm:$0xff]  }
 0x1b6   :  { %1819 = vmatprep.subr.bf16.mxu0 %v3033_v33  ;;  %v1896_v33 = vadd.f32 %v1895_v28, %v1894_v26  ;;  %v3064_v26 = vld [vmem:[#allocation10 + $0x58] sm:$0xff]   ;;  %v3066_v28 = vld [vmem:[#allocation10 + $0x60] sm:$0xff]  }
 0x1b9   :  { %1820 = vmatpush1.bf16.msra.mxu0 %v3031_v35  ;;  %v1917_v35 = vrot.slane %v1916_v31, 4 }
 0x1bc   :  { %1822 = vmatmul.mubr.bf16.vlgmr.msra.gmra.mrb[16].mxu0 %v884_v19  ;;  %v1924_v19 = vrot.slane %v1923_v32, 4 }
 0x1e5   :  { %v844_v37 = vpop.xlane.xlu0 %843 }
 0x1e6   :  { %v845_v22 = vsub.f32 %v3419_v40, %v844_v37  ;;  %v3048_v40 = vld [vmem:[#allocation8 + $0x44] ss:$8 sps:$4 sm:$0xff]   ;;  %v1897_v37 = vrot.slane %v1896_v33, 2 }
 0x1e7   :  { %2053 = vmatprep.subr.bf16.mxu1 %v3048_v40 }
 0x1e8   :  { %v846_v38 = vmul.f32 1.442695, %v845_v22  ;;  %2054 = vmatpush1.bf16.msra.mxu1 %v3046_v47  ;;  %v1904_v22 = vrot.slane %v1903_v34, 2  ;;  %v1898_v41 = vadd.f32 %v1897_v37, %v1896_v33  ;;  %v3052_v47 = vld [vmem:[#allocation8 + $0x60] ss:$8 sps:$4 sm:$0xff]   ;;  %v3072_v33 = vld [vmem:[#allocation10 + $0x78] sm:$0xff]  }
 0x1e9   :  { %2055 = vmatprep.subr.bf16.mxu1 %v3051_v44 }
 0x1ea   :  { %3074 = vpow2.f32 %v846_v38  ;;  %v1918_v38 = vadd.f32 %v1917_v35, %v1916_v31  ;;  %v1905_v14 = vadd.f32 %v1904_v22, %v1903_v34  ;;  %v3070_v31 = vld [vmem:[#allocation10 + $0x70] sm:$0xff]   ;;  %v3073_v34 = vld [vmem:[#allocation10 + $0x38] sm:$0xff]  }
 0x1eb   :  { %v1953_v35 = vld [vmem:[%s3589_s13] sm:$0x3] }
 0x1ec   :  { %v1919_v42 = vrot.slane %v1918_v38, 2  ;;  %2056 = vmatpush1.bf16.msra.mxu1 %v3049_v45  ;;  %v1962_v37 = vrot.slane %v1953_v35, %v3408_v23  ;;  %v3492_v45 = vld [vmem:[%s3581_s5] sm:$0x3] }
 0x1ed   :  { %2057 = vmatprep.subr.bf16.mxu1 %v3054_v46  ;;  %vm2283_vm5 = vcmp.ne.f32.partialorder %v3492_v45, -11.0 }
 0x1ee   :  { %v1920_v36 = vadd.f32 %v1919_v42, %v1918_v38  ;;  %v2297_v46 = vsel %vm2283_vm5, %v3410_v24, 128 }
 0x1f0   :  { %v1921_v53 = vrot.slane %v1920_v36, 1  ;;  %2058 = vmatpush1.bf16.msra.mxu1 %v3052_v47 }
 0x1f4   :  { %v3075_v39 = vpop.eup %3074 }
 0x1f5   :  { %848 = vadd.xlane.f32.xlu0 %v3075_v39 }
 0x22f   :  { %v1700_v48 = vpop.f32.mrb[8].mxu1 }
 0x230   :  { %v1702_v49 = vpop.f32.mrb[9].mxu1  ;;  %v1701_v56 = vadd.f32 %v1700_v48, %v1019_v54  ;;  %v1899_v48 = vrot.slane %v1898_v41, 1 }
 0x231   :  { %v1704_v50 = vpop.f32.mrb[10].mxu1  ;;  %v1703_v57 = vadd.f32 %v1702_v49, %v1023_v55  ;;  %v1906_v49 = vrot.slane %v1905_v14, 1 }
 0x232   :  { %v1705_v51 = vpop.f32.mrb[11].mxu1  ;;  %v1888_v50 = vld [vmem:[%s3602_s25] sm:$0x3] }
 0x233   :  { %v1889_v51 = vld [vmem:[%s3580_s4] sm:$0x3] }
 0x234   :  { %v1890_v55 = vadd.f32 %v1889_v51, %v1888_v50 }
 0x24f   :  { %v1741_v58 = vpop.f32.mrb[12].mxu0 }
 0x250   :  { %v1742_v59 = vadd.f32 %v1741_v58, %v1701_v56  ;;  %v1743_v60 = vpop.f32.mrb[13].mxu0  ;;  %v1900_v56 = vadd.f32 %v1899_v48, %v1898_v41  ;;  %v1922_v58 = vadd.f32 %v1921_v53, %v1920_v36 }
 0x251   :  { %v1744_v61 = vadd.f32 %v1743_v60, %v1703_v57  ;;  %v1745_v62 = vpop.f32.mrb[14].mxu0  ;;  %v1907_v57 = vadd.f32 %v1906_v49, %v1905_v14 }
 0x252   :  { %v1746_v63 = vpop.f32.mrb[15].mxu0  ;;  %v3057_v62 = vld [vmem:[#allocation8 + $0x74] ss:$8 sps:$4 sm:$0xff]  }
 0x253   :  { %v1911_v60 = vsel %vm1910_vm3, %v1907_v57, %v1900_v56  ;;  %2059 = vmatprep.subr.bf16.mxu1 %v3057_v62 }
 0x254   :  { %v1913_v63 = vadd.f32 %v1911_v60, %v1890_v55 }
 0x26f   :  { %v1782_v0 = vpop.f32.mrb[12].mxu1 }
 0x270   :  { %v1783_v2 = vadd.f32 %v1782_v0, %v1742_v59  ;;  %v1784_v3 = vpop.f32.mrb[13].mxu1 }
 0x271   :  { %v1785_v4 = vadd.f32 %v1784_v3, %v1744_v61  ;;  %v1786_v5 = vpop.f32.mrb[14].mxu1  ;;  %v3055_v61 = vld [vmem:[#allocation8 + $0x70] ss:$8 sps:$4 sm:$0xff]  }
 0x272   :  { %v1787_v6 = vpop.f32.mrb[15].mxu1  ;;  %2060 = vmatpush1.bf16.msra.mxu1 %v3055_v61 }
 0x282   :  { %v849_v8 = vpop.xlane.xlu0 %848 }
 0x283   :  { %3076 = vrcp.f32 %v849_v8 }
 0x28d   :  { %v3077_v9 = vpop.eup %3076 }
 0x28e   :  { %v3448_v10 = vmul.f32 %v3077_v9, %v3075_v39  ;;  %v1925_v39 = vadd.f32 %v1924_v19, %v1923_v32  ;;  %v3071_v32 = vld [vmem:[#allocation10 + $0x30] sm:$0xff]   ;;  %v1958_v19 = vrot.slane %v1953_v35, %v3397_v20 }
 0x28f   :  { %v1823_v11 = vpop.f32.mrb[16].mxu0 }
 0x290   :  { %v3450_v12 = vadd.f32 %v1823_v11, %v1783_v2  ;;  %v1825_v13 = vpop.f32.mrb[17].mxu0  ;;  %852 = vmax.xlane.f32.xlu1 %v3448_v10  ;;  %v1926_v43 = vrot.slane %v1925_v39, 2  ;;  %v3058_v11 = vld [vmem:[#allocation10 + $0x40] sm:$0xff]  }
 0x291   :  { %v3453_v15 = vadd.f32 %v1825_v13, %v1785_v4  ;;  %v1827_v16 = vpop.f32.mrb[18].mxu0  ;;  %v3059_v13 = vld [vmem:[#allocation10] sm:$0xff]   ;;  %2680 = vmatprep.subr.bf16.mxu0 %v3058_v11 }
 0x292   :  { %v1828_v17 = vpop.f32.mrb[19].mxu0  ;;  %v1927_v40 = vadd.f32 %v1926_v43, %v1925_v39  ;;  %v3060_v16 = vld [vmem:[#allocation10 + $0x48] sm:$0xff]   ;;  %2681 = vmatpush3.bf16.msra.mxu0 %v3059_v13  ;;  %v2651_v13 = vld [vmem:[%s3591_s15] ss:$0 sm:$0xff] }
 0x293   :  { %v3061_v17 = vld [vmem:[#allocation10 + $0x8] sm:$0xff]   ;;  %2682 = vmatprep.subr.bf16.mxu0 %v3060_v16 }
 0x294   :  { %v1928_v54 = vrot.slane %v1927_v40, 1 }
 0x296   :  { %v1929_v59 = vadd.f32 %v1928_v54, %v1927_v40  ;;  %2683 = vmatpush3.bf16.msra.mxu0 %v3061_v17  ;;  %v2298_v40 = vsel %vm1893_vm2, %v2297_v46, 2147483647  ;;  %v2313_v54 = vsel %vm2283_vm5, %v3410_v24, 4294967295 }
 0x297   :  { %2684 = vmatprep.subr.bf16.mxu0 %v3062_v18  ;;  %v2300_v47 = vshra.s32 %v2298_v40, 16  ;;  %v2299_v55 = vand.u32 65535, %v2298_v40  ;;  %v2314_v57 = vsel %vm1893_vm2, %v2313_v54, 2147483648 }
 0x298   :  { %v1932_v0 = vsel %vm1910_vm3, %v1929_v59, %v1922_v58  ;;  %v2316_v62 = vshra.s32 %v2314_v57, 16  ;;  %v2315_v16 = vand.u32 65535, %v2314_v57 }
 0x299   :  { %v1934_v2 = vadd.f32 %v1932_v0, %v1913_v63  ;;  %v2302_v51 = vcvt.s32.f32 %v2300_v47  ;;  %v2301_v60 = vcvt.s32.f32 %v2299_v55 }
 0x29a   :  { %2685 = vmatpush3.bf16.msra.mxu0 %v3063_v25 }
 0x29b   :  { %v1935_v3 = vmul.f32 0.16666667, %v1934_v2  ;;  %2686 = vmatprep.subr.bf16.mxu0 %v3064_v26  ;;  %v2317_v26 = vcvt.s32.f32 %v2315_v16 }
 0x29d   :  { %v1936_v4 = vpack.c.bf16 %v1935_v3, %v1935_v3  ;;  %v2318_v3 = vcvt.s32.f32 %v2316_v62 }
 0x29e   :  { %2687 = vmatpush3.bf16.msra.mxu0 %v3065_v27 }
 0x29f   :  { %2078 = vmatmul.mubr.bf16.vlgmr.msra.gmra.mrb[16].mxu1 %v1936_v4  ;;  %2688 = vmatprep.subr.bf16.mxu0 %v3066_v28 }
 0x2a2   :  { %2689 = vmatpush3.bf16.msra.mxu0 %v3067_v29 }
 0x2a3   :  { %2690 = vmatprep.subr.bf16.mxu0 %v3068_v1 }
 0x2a6   :  { %2691 = vmatpush3.bf16.msra.mxu0 %v3069_v30 }
 0x2a7   :  { %2692 = vmatprep.subr.bf16.mxu0 %v3070_v31 }
 0x2aa   :  { %2693 = vmatpush3.bf16.msra.mxu0 %v3071_v32  ;;  %v2670_v32 = vsel %vm2283_vm5, 1.0, %v3209_v7 }
 0x2ab   :  { %2694 = vmatprep.subr.bf16.mxu0 %v3072_v33  ;;  %v3080_v33 = vld [vmem:[%s3600_s29] sm:$0xff]  ;;  %v2286_v7 = vsel %vm1893_vm2, %v2670_v32, 0.0 }
 0x2ac   :  { %v1831_v35 = vadd.f32 %v3080_v33, %v3453_v15  ;;  %v2631_v15 = vld [vmem:[%s3587_s11 + $0x1] ss:$0 sm:$0xff] }
 0x2ae   :  { %2695 = vmatpush3.bf16.msra.mxu0 %v3073_v34  ;;  %v1830_v34 = vadd.f32 %v3080_v33, %v3450_v12 }
 0x31d   :  { %v3479_v5 = vpop.xlane.xlu1 %852 }
 0x31e   :  { %vm854_vm4 = vcmp.eq.f32.partialorder %v3448_v10, %v3479_v5 }
 0x31f   :  { %v855_v6 = vsel %vm854_vm4, %v3410_v24, 8  ;;  %vm2358_vm4 = vcmp.eq.s32.totalorder %v3410_v24, 7 }
 0x320   :  { %v857_v8 = vshra.s32 %v855_v6, 16  ;;  %v856_v36 = vand.u32 65535, %v855_v6 }
 0x322   :  { %v859_v9 = vcvt.s32.f32 %v857_v8  ;;  %v858_v49 = vcvt.s32.f32 %v856_v36 }
 0x324   :  { %860 = vmin.xlane.f32.xlu1 %v859_v9 }
 0x372   :  { %v2079_v22 = vpop.f32.mrb[16].mxu1 }
 0x373   :  { %v2080_v38 = vadd.f32 %v2079_v22, %v1958_v19  ;;  %v2081_v39 = vpop.f32.mrb[17].mxu1  ;;  %v2632_v19 = vld [vmem:[%s3586_s10] ss:$0 sm:$0xff] }
 0x374   :  { %v2082_v41 = vadd.f32 %v2081_v39, %v1962_v37  ;;  %v2083_v14 = vpop.f32.mrb[18].mxu1  ;;  %v2634_v37 = vld [vmem:[%s3586_s10 + $0x1] ss:$0 sm:$0xff]  ;;  %v2289_v39 = vsel %vm2283_vm5, %v3492_v45, 1e+30 }
 0x375   :  { %v2086_v42 = vpack.c.bf16 %v2080_v38, %v2080_v38  ;;  %v2084_v43 = vpop.f32.mrb[19].mxu1  ;;  %v1857_v14 = vmul.f32 %v2632_v19, %v1830_v34  ;;  %v2290_v36 = vsel %vm1893_vm2, %v2289_v39, inf }
 0x376   :  { %v2087_v44 = vpack.c.bf16 %v2082_v41, %v2082_v41  ;;  %v2629_v41 = vld [vmem:[%s3587_s11] ss:$0 sm:$0xff] }
 0x378   :  { %2255 = vmatprep.mubr.bf16.mxu0 %v2087_v44 }
 0x379   :  { %2256 = vmatmul.mubr.bf16.vlgmr.msra.gmra.mrb[20].mxu0 %v2086_v42  ;;  %v1867_v42 = vmul.f32 %v2634_v37, %v1831_v35 }
 0x3b1   :  { %v861_v48 = vpop.xlane.xlu1 %860 }
 0x3b2   :  { %vm862_vm6 = vcmp.eq.f32.partialorder %v859_v9, %v861_v48  ;;  %v867_v53 = vcvt.f32.s32 %v861_v48 }
 0x3b3   :  { %v863_v50 = vsel %vm862_vm6, %v858_v49, inf  ;;  %vm2390_vm6 = vcmp.eq.s32.totalorder %v3410_v24, 2 }
 0x3b4   :  { %864 = vmin.xlane.f32.xlu0 %v863_v50  ;;  %v868_v58 = vshll.u32 %v867_v53, 16  ;;  %v2293_v50 = vsel %vm2283_vm5, %v3492_v45, -1e+30  ;;  %vm2375_vm5 = vcmp.eq.s32.totalorder %v3410_v24, 1 }
 0x3b5   :  { %v2294_v54 = vsel %vm1893_vm2, %v2293_v50, -inf }
 0x3b8   :  { %2303 = vmin.xlane.f32.xlu0 %v2302_v51 }
 0x441   :  { %v865_v56 = vpop.xlane.xlu0 %864 }
 0x442   :  { %v866_v59 = vcvt.f32.s32 %v865_v56 }
 0x444   :  { %v869_v61 = vadd.s32 %v868_v58, %v866_v59 }
 0x445   :  { %v2304_v63 = vpop.xlane.xlu0 %2303 }
 0x446   :  { %vm870_vm7 = vcmp.eq.s32.totalorder %v3410_v24, %v869_v61  ;;  %vm2305_vm8 = vcmp.eq.f32.partialorder %v2302_v51, %v2304_v63  ;;  %v2310_v1 = vcvt.f32.s32 %v2304_v63 }
 0x447   :  { %v871_v0 = vsel %vm870_vm7, -1e+30, %v3448_v10  ;;  %v2306_v2 = vsel %vm2305_vm8, %v2301_v60, inf  ;;  %v2668_v10 = vld [vmem:[%s3592_s16] ss:$0 sm:$0xff]  ;;  %vm2405_vm7 = vcmp.eq.s32.totalorder %v3410_v24, 3 }
 0x448   :  { %872 = vmax.xlane.f32.xlu1 %v871_v0  ;;  %2307 = vmin.xlane.f32.xlu0 %v2306_v2  ;;  %v2311_v22 = vshll.u32 %v2310_v1, 16 }
 0x44c   :  { %2319 = vmax.xlane.f32.xlu1 %v2318_v3  ;;  %v2696_v4 = vpop.f32.mrb[20].mxu0 }
 0x44d   :  { %v2697_v6 = vpop.f32.mrb[21].mxu0 }
 0x44e   :  { %v2698_v8 = vadd.f32 %v2697_v6, %v2696_v4  ;;  %v2699_v9 = vpop.f32.mrb[22].mxu0 }
 0x44f   :  { %v2700_v11 = vpop.f32.mrb[23].mxu0 }
 0x450   :  { %v2258_v18 = vadd.f32 %v2698_v8, %v2651_v13  ;;  %v2669_v8 = vld [vmem:[#allocation2] ss:$0 sm:$0xff] }
 0x452   :  { %v2270_v28 = vmul.f32 %v2668_v10, %v2258_v18 }
 0x454   :  { %v2271_v31 = vsel %vm1893_vm2, %v2270_v28, 0.0 }
 0x4d5   :  { %v873_v17 = vpop.xlane.xlu1 %872  ;;  %v2308_v30 = vpop.xlane.xlu0 %2307 }
 0x4d6   :  { %v874_v25 = vadd.f32 %v873_v17, %v3479_v5  ;;  %v2309_v38 = vcvt.f32.s32 %v2308_v30 }
 0x4d8   :  { %3078 = vrcp.f32 %v874_v25  ;;  %v2312_v46 = vadd.s32 %v2311_v22, %v2309_v38 }
 0x4d9   :  { %v2320_v27 = vpop.xlane.xlu1 %2319 }
 0x4da   :  { %vm2321_vm9 = vcmp.eq.f32.partialorder %v2318_v3, %v2320_v27  ;;  %vm2329_vm10 = vcmp.eq.s32.totalorder %v3410_v24, %v2312_v46  ;;  %v2326_v56 = vcvt.f32.s32 %v2320_v27 }
 0x4db   :  { %v2322_v29 = vsel %vm2321_vm9, %v2317_v26, -inf }
 0x4dc   :  { %2323 = vmax.xlane.f32.xlu1 %v2322_v29  ;;  %v2327_v58 = vshll.u32 %v2326_v56, 16 }
 0x4e0   :  { %2272 = vadd.xlane.f32.xlu1 %v2271_v31 }
 0x4e2   :  { %v3079_v12 = vpop.eup %3078 }
 0x4e3   :  { %v877_v43 = vmul.f32 %v3079_v12, %v873_v17  ;;  %v876_v44 = vmul.f32 %v3079_v12, %v3479_v5  ;;  %v2330_v5 = vsel %vm2329_vm10, %v3492_v45, 0.0 }
 0x4e4   :  { %2287 = vadd.xlane.f32.xlu1 %v2286_v7  ;;  %v2331_v55 = vsel %vm1893_vm2, %v2330_v5, 0.0 }
 0x4e5   :  { %v1848_v40 = vmul.f32 %v2631_v15, %v877_v43  ;;  %v1868_v47 = vmul.f32 %v1867_v42, %v877_v43  ;;  %v1839_v48 = vmul.f32 %v2629_v41, %v876_v44  ;;  %v1858_v49 = vmul.f32 %v1857_v14, %v876_v44 }
 0x4e7   :  { %v1849_v51 = vadd.f32 %v1848_v40, %v1839_v48  ;;  %v1869_v53 = vadd.f32 %v1868_v47, %v1858_v49 }
 0x4e8   :  { %2291 = vmin.xlane.f32.xlu1 %v2290_v36 }
 0x4e9   :  { %1873 = vperm.xlu0 %2736, %v1849_v51  }
 0x4ec   :  { %2295 = vmax.xlane.f32.xlu1 %v2294_v54 }
 0x4f0   :  { %2332 = vadd.xlane.f32.xlu1 %v2331_v55 }
 0x568   :  { %v1874_v59 = vpop.permute.xlu0 %1873 }
 0x569   :  { %v2324_v57 = vpop.xlane.xlu1 %2323  ;;  %v1876_v62 = vsel %vm1870_vm11, %v1874_v59, 0.0 }
 0x56a   :  { %v2325_v60 = vcvt.f32.s32 %v2324_v57  ;;  %v1877_v0 = vadd.f32 %v1876_v62, %v1869_v53 }
 0x56c   :  { %v2328_v61 = vadd.s32 %v2327_v58, %v2325_v60  ;;  %v1882_v3 = vsel %vm1881_vm13, %v1877_v0, 0.0  ;;  %v1879_v4 = vcombine.high %v1877_v0, %v1877_v0 }
 0x56d   :  { %v2273_v9 = vpop.xlane.xlu1 %2272 }
 0x56e   :  { %vm2334_vm12 = vcmp.eq.s32.totalorder %v3410_v24, %v2328_v61  ;;  %v1885_v6 = vsel %vm1881_vm13, %v1879_v4, 0.0  ;;  %v2281_v11 = vadd.f32 %v2669_v8, %v2273_v9 }
 0x56f   :  { %v2335_v63 = vsel %vm2334_vm12, %v3492_v45, 0.0 }
 0x570   :  { %v2336_v2 = vsel %vm1893_vm2, %v2335_v63, 0.0 }
 0x571   :  { %2337 = vadd.xlane.f32.xlu1 %v2336_v2  ;;  %v2288_v13 = vpop.xlane.xlu1 %2287 }
 0x572   :  { %vm2339_vm14 = vcmp.gt.f32.partialorder %v2288_v13, 0.0  ;;  %vm2342_vm2 = vcmp.gt.f32.partialorder %v2288_v13, 1.0 }
 0x575   :  { %1883 = vadd.xlane.f32.xlu1 %v1882_v3  ;;  %v2292_v16 = vpop.xlane.xlu1 %2291 }
 0x576   :  { %v2340_v26 = vsel %vm2339_vm14, %v2292_v16, nan }
 0x577   :  { %v2353_v30 = vsel %vm2352_vm15, %v2340_v26, 0.0 }
 0x579   :  { %1886 = vadd.xlane.f32.xlu1 %v1885_v6  ;;  %v2296_v17 = vpop.xlane.xlu1 %2295 }
 0x57a   :  { %v2341_v28 = vsel %vm2339_vm14, %v2296_v17, nan }
 0x57b   :  { %v2356_v19 = vsel %vm2355_vm1, %v2341_v28, 0.0 }
 0x57d   :  { %v2333_v18 = vpop.xlane.xlu1 %2332 }
 0x58a   :  { %2348 = vperm.xlu1 %2737, %v2281_v11  }
 0x5fe   :  { %v2338_v25 = vpop.xlane.xlu1 %2337 }
 0x5ff   :  { %v2343_v27 = vsub.f32 %v2338_v25, %v2333_v18 }
 0x601   :  { %v2344_v32 = vsel %vm2342_vm2, %v2343_v27, 0.0 }
 0x602   :  { %v1884_v45 = vpop.xlane.xlu1 %1883  ;;  %v2359_v39 = vsel %vm2358_vm4, %v2344_v32, 0.0 }
 0x603   :  { %v2364_v33 = vrot.slane %v1884_v45, %v3397_v20  ;;  %v2379_v37 = vrot.slane %v1884_v45, %v3408_v23  ;;  %v2394_v12 = vrot.slane %v1884_v45, %v3400_v21 }
 0x606   :  { %v1887_v10 = vpop.xlane.xlu1 %1886 }
 0x607   :  { %v2368_v29 = vrot.slane %v1887_v10, %v3397_v20  ;;  %v2383_v34 = vrot.slane %v1887_v10, %v3408_v23  ;;  %v2398_v22 = vrot.slane %v1887_v10, %v3400_v21  ;;  %v2413_v20 = vrot.slane %v1887_v10, %v3423_v52 }
 0x608   :  { %v2409_v23 = vrot.slane %v1884_v45, %v3423_v52 }
 0x609   :  { %v2371_v38 = vsel %vm1910_vm3, %v2368_v29, %v2364_v33  ;;  %v2386_v15 = vsel %vm1910_vm3, %v2383_v34, %v2379_v37  ;;  %v2401_v42 = vsel %vm1910_vm3, %v2398_v22, %v2394_v12 }
 0x60a   :  { %v2349_v1 = vpop.permute.xlu1 %2348  ;;  %v2373_v14 = vsel %vm1870_vm11, %v2371_v38, 0.0  ;;  %v2388_v44 = vsel %vm2375_vm5, %v2386_v15, 0.0  ;;  %v2416_v21 = vsel %vm1910_vm3, %v2413_v20, %v2409_v23  ;;  %v2403_v36 = vsel %vm2390_vm6, %v2401_v42, 0.0 }
 0x60b   :  { %v2351_v31 = vsel %vm2345_vm0, %v2349_v1, 0.0  ;;  %v2418_v47 = vsel %vm2405_vm7, %v2416_v21, 0.0 }
 0x60c   :  { %v2354_v35 = vadd.f32 %v2353_v30, %v2351_v31 }
 0x60e   :  { %v2357_v7 = vadd.f32 %v2356_v19, %v2354_v35 }
 0x610   :  { %v2360_v41 = vadd.f32 %v2359_v39, %v2357_v7 }
 0x612   :  { %v2374_v43 = vadd.f32 %v2373_v14, %v2360_v41 }
 0x614   :  { %v2389_v46 = vadd.f32 %v2388_v44, %v2374_v43 }
 0x616   :  { %v2404_v40 = vadd.f32 %v2403_v36, %v2389_v46 }
 0x618   :  { %v2419_v48 = vadd.f32 %v2418_v47, %v2404_v40 }
 0x61a   :  { %2420 = vst [vmem:[%s3594_s18] sm:$0x3] %v2419_v48 }
 0x61b   :  { %2425 = vsyncpa [#allocation4], 1 }
 0x61c   :  { %2426 = vsyncpa [#allocation6], 1 }
 0x61d   :  { %2427 = vsyncpa [#allocation9], 1 }

</bundles_post_ra>
